<compile_context>
chip_gen: v7x
topology: tpu7x:2x2x1
jax: 0.10.0
libtpu: 0.0.40
codegen_flags: <defaults>
</compile_context>

<pallas_src>
import functools

import jax
import jax.numpy as jnp
from jax.experimental import pallas as pl
from jax.experimental.pallas import tpu as pltpu


def _layer_norm(x, gamma, beta, eps=1e-5):
    mu = jnp.mean(x, axis=-1, keepdims=True)
    var = jnp.mean((x - mu) ** 2, axis=-1, keepdims=True)
    return (x - mu) * jax.lax.rsqrt(var + eps) * gamma + beta


def _gelu_exact(x):
    # nn.GELU() default is the exact erf form: 0.5*x*(1+erf(x/sqrt(2))).
    # erf via Abramowitz-Stegun 7.1.26 (max abs err ~1.5e-7) -> only exp/mul/
    # add/reciprocal, guaranteed to lower in Mosaic.  The 1/(1+p*a) term uses
    # the EUP approximate reciprocal (off the VALU critical path).
    z = x * 0.7071067811865476
    sgn = jnp.where(z >= 0.0, 1.0, -1.0)
    a = jnp.abs(z)
    t = pl.reciprocal(1.0 + 0.3275911 * a, approx=True)
    poly = t * (0.254829592 + t * (-0.284496736 + t * (1.421413741
                + t * (-1.453152027 + t * 1.061405429))))
    erf = sgn * (1.0 - poly * jnp.exp(-a * a))
    return 0.5 * x * (1.0 + erf)


def _transformer_layer_kernel(q_ref, k_ref, v_ref, *rest,
                              mask, num_head, key_query_same, apply_pos):
    out_ref, scores_ref, ctx_ref = rest[-3], rest[-2], rest[-1]
    w = rest[:-3]

    # ---- unpack weights (Wq/bq only present when not key_query_same) ----
    wk, bk = w[0][...], w[1][...]
    if key_query_same:
        wq, bq = wk, bk
        base = 2
    else:
        wq, bq = w[2][...], w[3][...]
        base = 4
    wv, bv = w[base + 0][...], w[base + 1][...]
    wo, bo = w[base + 2][...], w[base + 3][...]
    ln1g, ln1b = w[base + 4][...], w[base + 5][...]
    w1, b1 = w[base + 6][...], w[base + 7][...]
    w2, b2 = w[base + 8][...], w[base + 9][...]
    ln2g, ln2b = w[base + 10][...], w[base + 11][...]

    Bt, tq, D = q_ref.shape
    L = k_ref.shape[1]
    H = num_head
    dk = D // H

    # Fold batch into the matmul M dimension.
    xq = q_ref[...].reshape(Bt * tq, D)
    xk = k_ref[...].reshape(Bt * L, D)
    xv = v_ref[...].reshape(Bt * L, D)

    def proj(x, wm, bias):
        y = jnp.dot(x.astype(jnp.bfloat16), wm,
                    preferred_element_type=jnp.float32) + bias
        return y.astype(jnp.bfloat16)          # single bf16 cast per tensor

    Qb = proj(xq, wq, bq).reshape(Bt, tq, D)   # (Bt, tq, D) bf16
    Kb = proj(xk, wk, bk).reshape(Bt, L, D)    # (Bt, L, D)  bf16
    Vb = proj(xv, wv, bv).reshape(Bt, L, D)    # (Bt, L, D)  bf16

    # ---- mask / zero-pad tensors, hoisted (computed once per block) ----
    q0 = pl.program_id(1) * tq                               # global query row
    row = q0 + jax.lax.broadcasted_iota(jnp.int32, (tq, L), 0)
    col = jax.lax.broadcasted_iota(jnp.int32, (tq, L), 1)
    use_src_mask = mask in (0, 1)            # mask >= 2 -> bert mask (all ones)
    zero_pad = (mask == 0)
    if use_src_mask:
        # np.triu(ones, k=mask) == 0  <=>  col < row + mask (allowed positions)
        allowed = (col < (row + mask))[None]                  # (1, tq, L)
    if zero_pad:
        not_row0 = (row != 0)[None]                           # (1, tq, L)

    scale = 1.0 / float(dk) ** 0.5
    # Head loop: each head handles the whole (Bt, tq) tile with one batched
    # 3-D contraction; probs and context are streamed directly into their
    # destination buffers (no per-head lists, no concatenates).
    for h in range(H):
        lo = h * dk
        Qh = Qb[:, :, lo:lo + dk]            # (Bt, tq, dk) bf16
        Kh = Kb[:, :, lo:lo + dk]            # (Bt, L,  dk) bf16
        Vh = Vb[:, :, lo:lo + dk]

        s = jnp.einsum('bqd,bkd->bqk', Qh, Kh,
                       preferred_element_type=jnp.float32) * scale  # (Bt,tq,L)
        if use_src_mask:
            s = jnp.where(allowed, s, -1e32)
        # softmax in f32; denominator reciprocal on the EUP
        m = jnp.max(s, axis=-1, keepdims=True)
        e = jnp.exp(s - m)
        p = e * pl.reciprocal(jnp.sum(e, axis=-1, keepdims=True), approx=True)
        if zero_pad:
            p = jnp.where(not_row0, p, 0.0)

        scores_ref[:, h, :, :] = p.astype(scores_ref.dtype)   # lane-dense store

        ctx = jnp.einsum('bqk,bkd->bqd', p.astype(jnp.bfloat16), Vh,
                         preferred_element_type=jnp.float32)  # (Bt, tq, dk)
        ctx_ref[:, :, lo:lo + dk] = ctx.astype(ctx_ref.dtype)

    attn = jnp.dot(ctx_ref[...].reshape(Bt * tq, D), wo,
                   preferred_element_type=jnp.float32) + bo

    # residual + LayerNorm1 (dropout1 identity in eval)
    x = _layer_norm(xq.astype(jnp.float32) + attn, ln1g, ln1b)

    if apply_pos:
        h1 = jnp.dot(x.astype(jnp.bfloat16), w1,
                     preferred_element_type=jnp.float32) + b1
        h1 = _gelu_exact(h1)                 # GELU (dropout identity in eval)
        h2 = jnp.dot(h1.astype(jnp.bfloat16), w2,
                     preferred_element_type=jnp.float32) + b2
        x = _layer_norm(x + h2, ln2g, ln2b)

    out_ref[...] = x.reshape(Bt, tq, D).astype(out_ref.dtype)


def transformer_layer_clkt(mask, query, key, values, params, *,
                           num_head, key_query_same=True, apply_pos=True,
                           batch_tile=None, q_tile=None,
                           scores_dtype=jnp.float32,
                           vmem_budget_bytes=48 * 1024 * 1024):
    if query.dtype not in (jnp.float32, jnp.bfloat16):
        query = query.astype(jnp.float32)
    key = key.astype(query.dtype)
    values = values.astype(query.dtype)

    B, L, D = query.shape
    H = num_head
    assert D % H == 0, "dim_model must be divisible by num_head"

    weight_names = ["Wk", "bk"]
    if not key_query_same:
        weight_names += ["Wq", "bq"]          # skipped entirely when kq_same
    weight_names += ["Wv", "bv", "Wo", "bo",
                     "ln1_g", "ln1_b", "W1", "b1", "W2", "b2", "ln2_g", "ln2_b"]
    # MXU weight matrices travel as bf16 (half the DMA bytes); biases/LN stay f32.
    bf16_names = {"Wk", "Wq", "Wv", "Wo", "W1", "W2"}
    weights = [params[n].astype(jnp.bfloat16) if n in bf16_names
               else params[n].astype(jnp.float32) for n in weight_names]

    F = params["W1"].shape[1]
    act_bytes = jnp.dtype(query.dtype).itemsize
    sc_bytes = jnp.dtype(scores_dtype).itemsize
    w_bytes = sum(int(w.size) * jnp.dtype(w.dtype).itemsize for w in weights)

    def vmem_est(bt, t):
        blocks = 2 * (bt * t * D * act_bytes          # q   (double buffered)
                      + 2 * bt * L * D * act_bytes     # k, v (resident across q)
                      + bt * t * D * 4                 # out
                      + bt * H * t * L * sc_bytes)     # scores
        scratch = bt * t * D * 2                       # bf16 ctx scratch
        inter = ((bt * t * D + 2 * bt * L * D) * 6     # f32 proj + bf16 copies
                 + bt * H * t * L * 8                  # f32 score/prob transients
                 + bt * t * F * 6                      # FFN hidden f32 + bf16
                 + bt * t * D * 8)
        return blocks + scratch + w_bytes + inter

    # ---- tile selection: shrink batch tile, then query tile, to fit budget ----
    Bt = B if batch_tile is None else batch_tile
    assert B % Bt == 0, "batch_tile must divide batch"
    tq = L if q_tile is None else q_tile
    assert L % tq == 0 and (tq == L or tq % 8 == 0), "bad q_tile"

    if batch_tile is None:
        while vmem_est(Bt, tq) > vmem_budget_bytes and Bt > 1 and Bt % 2 == 0:
            Bt //= 2
    if q_tile is None:
        while (vmem_est(Bt, tq) > vmem_budget_bytes and tq % 2 == 0
               and (tq // 2) % 8 == 0 and L % (tq // 2) == 0):
            tq //= 2

    vmem_limit = int(min(max(vmem_est(Bt, tq) + (8 << 20), 32 << 20), 128 << 20))

    kernel = functools.partial(
        _transformer_layer_kernel,
        mask=int(mask), num_head=H,
        key_query_same=bool(key_query_same), apply_pos=bool(apply_pos))

    q_spec = pl.BlockSpec((Bt, tq, D), lambda b, q: (b, q, 0))
    kv_spec = pl.BlockSpec((Bt, L, D), lambda b, q: (b, 0, 0))   # q-invariant
    # Grid-invariant weights: whole-array VMEM residents, fetched once,
    # single-buffered (no double-buffer waste).
    w_spec = pl.BlockSpec(memory_space=pltpu.MemorySpace.VMEM)
    in_specs = [q_spec, kv_spec, kv_spec] + [w_spec] * len(weights)
    out_specs = [
        pl.BlockSpec((Bt, tq, D), lambda b, q: (b, q, 0)),
        pl.BlockSpec((Bt, H, tq, L), lambda b, q: (b, 0, q, 0)),
    ]
    out_shape = [
        jax.ShapeDtypeStruct((B, L, D), jnp.float32),
        jax.ShapeDtypeStruct((B, H, L, L), scores_dtype),
    ]

    return pl.pallas_call(
        kernel,
        grid=(B // Bt, L // tq),
        in_specs=in_specs,
        out_specs=out_specs,
        out_shape=out_shape,
        scratch_shapes=[pltpu.VMEM((Bt, tq, D), jnp.bfloat16)],
        compiler_params=pltpu.CompilerParams(
            dimension_semantics=("parallel", "parallel"),
            vmem_limit_bytes=vmem_limit),
    )(query, key, values, *weights)


def make_params(rng, dim_model, dim_ff):
    ks = jax.random.split(rng, 8)
    n = lambda k, shape, s=0.1: (s * jax.random.normal(k, shape)).astype(jnp.float32)
    D, F = dim_model, dim_ff
    return {
        # attention projections (in_dim, out_dim); biases as (1, out_dim)
        "Wk": n(ks[0], (D, D)), "bk": n(ks[1], (1, D), 0.02),
        "Wq": n(ks[2], (D, D)), "bq": jnp.zeros((1, D), jnp.float32),
        "Wv": n(ks[3], (D, D)), "bv": jnp.zeros((1, D), jnp.float32),
        "Wo": n(ks[4], (D, D)), "bo": jnp.zeros((1, D), jnp.float32),
        # LayerNorm1 (PyTorch default init: weight=1, bias=0)
        "ln1_g": jnp.ones((1, D), jnp.float32),
        "ln1_b": jnp.zeros((1, D), jnp.float32),
        # feed-forward
        "W1": n(ks[5], (D, F)), "b1": n(ks[6], (1, F), 0.02),
        "W2": n(ks[7], (F, D)), "b2": jnp.zeros((1, D), jnp.float32),
        # LayerNorm2
        "ln2_g": jnp.ones((1, D), jnp.float32),
        "ln2_b": jnp.zeros((1, D), jnp.float32),
    }


if __name__ == "__main__":
    # small shapes consistent with the module: batch=2, seq=8, dim_model=32,
    # num_head=2, dim_ff=64
    B, L, D, H, FF = 2, 8, 32, 2, 64

    root = jax.random.PRNGKey(0)
    k_p, k_q, k_k, k_v = jax.random.split(root, 4)
    params = make_params(k_p, D, FF)
    query = jax.random.normal(k_q, (B, L, D), dtype=jnp.float32)
    key = jax.random.normal(k_k, (B, L, D), dtype=jnp.float32)
    values = jax.random.normal(k_v, (B, L, D), dtype=jnp.float32)

    # mask=0 path: strict no-peek mask (col < row) + zero_pad=True
    out, attn_scores = transformer_layer_clkt(
        0, query, key, values, params,
        num_head=H, key_query_same=True, apply_pos=True)
    jax.block_until_ready((out, attn_scores))

    assert out.shape == (B, L, D)
    assert attn_scores.shape == (B, H, L, L)
    assert bool(jnp.all(jnp.isfinite(out)))
    # zero_pad: first query row's attention probabilities are zeroed
    assert bool(jnp.all(attn_scores[:, :, 0, :] == 0.0))
    print("KERNEL_OK")
</pallas_src>

<mosaic_0001>
module attributes {stable_mosaic.version = 11 : i64} {
  func.func @_transformer_layer_kernel(%arg0: i32, %arg1: i32, %arg2: memref<2x8x32xf32, #tpu.memory_space<vmem>>, %arg3: memref<2x8x32xf32, #tpu.memory_space<vmem>>, %arg4: memref<2x8x32xf32, #tpu.memory_space<vmem>>, %arg5: memref<32x32xbf16, #tpu.memory_space<vmem>>, %arg6: memref<1x32xf32, #tpu.memory_space<vmem>>, %arg7: memref<32x32xbf16, #tpu.memory_space<vmem>>, %arg8: memref<1x32xf32, #tpu.memory_space<vmem>>, %arg9: memref<32x32xbf16, #tpu.memory_space<vmem>>, %arg10: memref<1x32xf32, #tpu.memory_space<vmem>>, %arg11: memref<1x32xf32, #tpu.memory_space<vmem>>, %arg12: memref<1x32xf32, #tpu.memory_space<vmem>>, %arg13: memref<32x64xbf16, #tpu.memory_space<vmem>>, %arg14: memref<1x64xf32, #tpu.memory_space<vmem>>, %arg15: memref<64x32xbf16, #tpu.memory_space<vmem>>, %arg16: memref<1x32xf32, #tpu.memory_space<vmem>>, %arg17: memref<1x32xf32, #tpu.memory_space<vmem>>, %arg18: memref<1x32xf32, #tpu.memory_space<vmem>>, %arg19: memref<2x8x32xf32, #tpu.memory_space<vmem>>, %arg20: memref<2x2x8x8xf32, #tpu.memory_space<vmem>>, %arg21: memref<2x8x32xbf16, #tpu.memory_space<vmem>>) attributes {dimension_semantics = [#tpu.dimension_semantics<parallel>, #tpu.dimension_semantics<parallel>], iteration_bounds = array<i64: 1, 1>, scalar_prefetch = 0 : i64, scratch_operands = 1 : i64, tpu.core_type = #tpu.core_type<tc>, window_params = [{transform_indices = @transform_0, window_bounds = array<i64: 2, 8, 32>}, {transform_indices = @transform_1, window_bounds = array<i64: 2, 8, 32>}, {transform_indices = @transform_2, window_bounds = array<i64: 2, 8, 32>}, {pipeline_mode = #tpu.pipeline_mode<synchronous>, transform_indices = @transform_3, window_bounds = array<i64: 32, 32>}, {pipeline_mode = #tpu.pipeline_mode<synchronous>, transform_indices = @transform_4, window_bounds = array<i64: 1, 32>}, {pipeline_mode = #tpu.pipeline_mode<synchronous>, transform_indices = @transform_5, window_bounds = array<i64: 32, 32>}, {pipeline_mode = #tpu.pipeline_mode<synchronous>, transform_indices = @transform_6, window_bounds = array<i64: 1, 32>}, {pipeline_mode = #tpu.pipeline_mode<synchronous>, transform_indices = @transform_7, window_bounds = array<i64: 32, 32>}, {pipeline_mode = #tpu.pipeline_mode<synchronous>, transform_indices = @transform_8, window_bounds = array<i64: 1, 32>}, {pipeline_mode = #tpu.pipeline_mode<synchronous>, transform_indices = @transform_9, window_bounds = array<i64: 1, 32>}, {pipeline_mode = #tpu.pipeline_mode<synchronous>, transform_indices = @transform_10, window_bounds = array<i64: 1, 32>}, {pipeline_mode = #tpu.pipeline_mode<synchronous>, transform_indices = @transform_11, window_bounds = array<i64: 32, 64>}, {pipeline_mode = #tpu.pipeline_mode<synchronous>, transform_indices = @transform_12, window_bounds = array<i64: 1, 64>}, {pipeline_mode = #tpu.pipeline_mode<synchronous>, transform_indices = @transform_13, window_bounds = array<i64: 64, 32>}, {pipeline_mode = #tpu.pipeline_mode<synchronous>, transform_indices = @transform_14, window_bounds = array<i64: 1, 32>}, {pipeline_mode = #tpu.pipeline_mode<synchronous>, transform_indices = @transform_15, window_bounds = array<i64: 1, 32>}, {pipeline_mode = #tpu.pipeline_mode<synchronous>, transform_indices = @transform_16, window_bounds = array<i64: 1, 32>}, {transform_indices = @transform_17, window_bounds = array<i64: 2, 8, 32>}, {transform_indices = @transform_18, window_bounds = array<i64: 2, 2, 8, 8>}]} {
    %c0 = arith.constant 0 : index
    %c0_0 = arith.constant 0 : index
    %0 = vector.load %arg5[%c0, %c0_0] : memref<32x32xbf16, #tpu.memory_space<vmem>>, vector<32x32xbf16>
    %c0_1 = arith.constant 0 : index
    %c0_2 = arith.constant 0 : index
    %1 = vector.load %arg6[%c0_1, %c0_2] : memref<1x32xf32, #tpu.memory_space<vmem>>, vector<1x32xf32>
    %c0_3 = arith.constant 0 : index
    %c0_4 = arith.constant 0 : index
    %2 = vector.load %arg7[%c0_3, %c0_4] : memref<32x32xbf16, #tpu.memory_space<vmem>>, vector<32x32xbf16>
    %c0_5 = arith.constant 0 : index
    %c0_6 = arith.constant 0 : index
    %3 = vector.load %arg8[%c0_5, %c0_6] : memref<1x32xf32, #tpu.memory_space<vmem>>, vector<1x32xf32>
    %c0_7 = arith.constant 0 : index
    %c0_8 = arith.constant 0 : index
    %4 = vector.load %arg9[%c0_7, %c0_8] : memref<32x32xbf16, #tpu.memory_space<vmem>>, vector<32x32xbf16>
    %c0_9 = arith.constant 0 : index
    %c0_10 = arith.constant 0 : index
    %5 = vector.load %arg10[%c0_9, %c0_10] : memref<1x32xf32, #tpu.memory_space<vmem>>, vector<1x32xf32>
    %c0_11 = arith.constant 0 : index
    %c0_12 = arith.constant 0 : index
    %6 = vector.load %arg11[%c0_11, %c0_12] : memref<1x32xf32, #tpu.memory_space<vmem>>, vector<1x32xf32>
    %c0_13 = arith.constant 0 : index
    %c0_14 = arith.constant 0 : index
    %7 = vector.load %arg12[%c0_13, %c0_14] : memref<1x32xf32, #tpu.memory_space<vmem>>, vector<1x32xf32>
    %c0_15 = arith.constant 0 : index
    %c0_16 = arith.constant 0 : index
    %8 = vector.load %arg13[%c0_15, %c0_16] : memref<32x64xbf16, #tpu.memory_space<vmem>>, vector<32x64xbf16>
    %c0_17 = arith.constant 0 : index
    %c0_18 = arith.constant 0 : index
    %9 = vector.load %arg14[%c0_17, %c0_18] : memref<1x64xf32, #tpu.memory_space<vmem>>, vector<1x64xf32>
    %c0_19 = arith.constant 0 : index
    %c0_20 = arith.constant 0 : index
    %10 = vector.load %arg15[%c0_19, %c0_20] : memref<64x32xbf16, #tpu.memory_space<vmem>>, vector<64x32xbf16>
    %c0_21 = arith.constant 0 : index
    %c0_22 = arith.constant 0 : index
    %11 = vector.load %arg16[%c0_21, %c0_22] : memref<1x32xf32, #tpu.memory_space<vmem>>, vector<1x32xf32>
    %c0_23 = arith.constant 0 : index
    %c0_24 = arith.constant 0 : index
    %12 = vector.load %arg17[%c0_23, %c0_24] : memref<1x32xf32, #tpu.memory_space<vmem>>, vector<1x32xf32>
    %c0_25 = arith.constant 0 : index
    %c0_26 = arith.constant 0 : index
    %13 = vector.load %arg18[%c0_25, %c0_26] : memref<1x32xf32, #tpu.memory_space<vmem>>, vector<1x32xf32>
    %c0_27 = arith.constant 0 : index
    %c0_28 = arith.constant 0 : index
    %c0_29 = arith.constant 0 : index
    %14 = vector.load %arg2[%c0_27, %c0_28, %c0_29] : memref<2x8x32xf32, #tpu.memory_space<vmem>>, vector<2x8x32xf32>
    %15 = vector.shape_cast %14 : vector<2x8x32xf32> to vector<16x32xf32>
    %c0_30 = arith.constant 0 : index
    %c0_31 = arith.constant 0 : index
    %c0_32 = arith.constant 0 : index
    %16 = vector.load %arg3[%c0_30, %c0_31, %c0_32] : memref<2x8x32xf32, #tpu.memory_space<vmem>>, vector<2x8x32xf32>
    %17 = vector.shape_cast %16 : vector<2x8x32xf32> to vector<16x32xf32>
    %c0_33 = arith.constant 0 : index
    %c0_34 = arith.constant 0 : index
    %c0_35 = arith.constant 0 : index
    %18 = vector.load %arg4[%c0_33, %c0_34, %c0_35] : memref<2x8x32xf32, #tpu.memory_space<vmem>>, vector<2x8x32xf32>
    %19 = vector.shape_cast %18 : vector<2x8x32xf32> to vector<16x32xf32>
    %20 = arith.truncf %15 : vector<16x32xf32> to vector<16x32xbf16>
    %cst = arith.constant dense<0.000000e+00> : vector<16x32xf32>
    %21 = tpu.matmul %20, %0, %cst {dimension_numbers = #tpu.dot_dimension_numbers<[1], [0], [0], [1], [0, 0, 1, 1], [], []>} : vector<16x32xbf16>, vector<32x32xbf16>, vector<16x32xf32> -> vector<16x32xf32>
    %22 = vector.broadcast %1 : vector<1x32xf32> to vector<16x32xf32>
    %23 = arith.addf %21, %22 : vector<16x32xf32>
    %24 = arith.truncf %23 : vector<16x32xf32> to vector<16x32xbf16>
    %25 = vector.shape_cast %24 : vector<16x32xbf16> to vector<2x8x32xbf16>
    %26 = arith.truncf %17 : vector<16x32xf32> to vector<16x32xbf16>
    %cst_36 = arith.constant dense<0.000000e+00> : vector<16x32xf32>
    %27 = tpu.matmul %26, %0, %cst_36 {dimension_numbers = #tpu.dot_dimension_numbers<[1], [0], [0], [1], [0, 0, 1, 1], [], []>} : vector<16x32xbf16>, vector<32x32xbf16>, vector<16x32xf32> -> vector<16x32xf32>
    %28 = vector.broadcast %1 : vector<1x32xf32> to vector<16x32xf32>
    %29 = arith.addf %27, %28 : vector<16x32xf32>
    %30 = arith.truncf %29 : vector<16x32xf32> to vector<16x32xbf16>
    %31 = vector.shape_cast %30 : vector<16x32xbf16> to vector<2x8x32xbf16>
    %32 = arith.truncf %19 : vector<16x32xf32> to vector<16x32xbf16>
    %cst_37 = arith.constant dense<0.000000e+00> : vector<16x32xf32>
    %33 = tpu.matmul %32, %2, %cst_37 {dimension_numbers = #tpu.dot_dimension_numbers<[1], [0], [0], [1], [0, 0, 1, 1], [], []>} : vector<16x32xbf16>, vector<32x32xbf16>, vector<16x32xf32> -> vector<16x32xf32>
    %34 = vector.broadcast %3 : vector<1x32xf32> to vector<16x32xf32>
    %35 = arith.addf %33, %34 : vector<16x32xf32>
    %36 = arith.truncf %35 : vector<16x32xf32> to vector<16x32xbf16>
    %37 = vector.shape_cast %36 : vector<16x32xbf16> to vector<2x8x32xbf16>
    %c8_i32 = arith.constant 8 : i32
    %38 = arith.muli %arg1, %c8_i32 : i32
    %39 = tpu.iota {dimensions = array<i32: 0>} : vector<8x8xi32>
    %40 = vector.broadcast %38 : i32 to vector<8x8xi32>
    %41 = arith.addi %40, %39 : vector<8x8xi32>
    %42 = tpu.iota {dimensions = array<i32: 1>} : vector<8x8xi32>
    %c0_i32 = arith.constant 0 : i32
    %43 = vector.broadcast %c0_i32 : i32 to vector<8x8xi32>
    %44 = arith.addi %41, %43 : vector<8x8xi32>
    %45 = arith.cmpi slt, %42, %44 : vector<8x8xi32>
    %46 = vector.shape_cast %45 : vector<8x8xi1> to vector<1x8x8xi1>
    %c0_i32_38 = arith.constant 0 : i32
    %47 = vector.broadcast %c0_i32_38 : i32 to vector<8x8xi32>
    %48 = arith.cmpi ne, %41, %47 : vector<8x8xi32>
    %49 = vector.shape_cast %48 : vector<8x8xi1> to vector<1x8x8xi1>
    %50 = vector.extract_strided_slice %25 {offsets = [0, 0, 0], sizes = [2, 8, 16], strides = [1, 1, 1]} : vector<2x8x32xbf16> to vector<2x8x16xbf16>
    %51 = vector.extract_strided_slice %31 {offsets = [0, 0, 0], sizes = [2, 8, 16], strides = [1, 1, 1]} : vector<2x8x32xbf16> to vector<2x8x16xbf16>
    %52 = vector.extract_strided_slice %37 {offsets = [0, 0, 0], sizes = [2, 8, 16], strides = [1, 1, 1]} : vector<2x8x32xbf16> to vector<2x8x16xbf16>
    "tpu.trace_start"() <{level = 10 : i32, message = "bqd,bkd->bqk"}> : () -> ()
    %cst_39 = arith.constant dense<0.000000e+00> : vector<2x8x8xf32>
    %53 = tpu.matmul %50, %51, %cst_39 {dimension_numbers = #tpu.dot_dimension_numbers<[2], [2], [1], [1], [0, 0, 0, 1, 1, 1], [0], [0]>} : vector<2x8x16xbf16>, vector<2x8x16xbf16>, vector<2x8x8xf32> -> vector<2x8x8xf32>
    "tpu.trace_stop"() : () -> ()
    %cst_40 = arith.constant 2.500000e-01 : f32
    %54 = vector.broadcast %cst_40 : f32 to vector<2x8x8xf32>
    %55 = arith.mulf %53, %54 : vector<2x8x8xf32>
    %cst_41 = arith.constant -1.000000e+32 : f32
    %56 = vector.shape_cast %46 : vector<1x8x8xi1> to vector<1x8x8xi1>
    %57 = vector.broadcast %56 : vector<1x8x8xi1> to vector<2x8x8xi1>
    %58 = vector.broadcast %cst_41 : f32 to vector<2x8x8xf32>
    %59 = arith.select %57, %55, %58 : vector<2x8x8xi1>, vector<2x8x8xf32>
    %cst_42 = arith.constant dense<0xFF800000> : vector<2x8xf32>
    %60 = vector.multi_reduction <maximumf>, %59, %cst_42 [2] : vector<2x8x8xf32> to vector<2x8xf32>
    %61 = vector.shape_cast %60 : vector<2x8xf32> to vector<2x8x1xf32>
    %62 = vector.broadcast %61 : vector<2x8x1xf32> to vector<2x8x8xf32>
    %63 = arith.subf %59, %62 : vector<2x8x8xf32>
    %64 = math.exp %63 : vector<2x8x8xf32>
    %cst_43 = arith.constant dense<0.000000e+00> : vector<2x8xf32>
    %65 = vector.multi_reduction <add>, %64, %cst_43 [2] : vector<2x8x8xf32> to vector<2x8xf32>
    %66 = vector.shape_cast %65 : vector<2x8xf32> to vector<2x8x1xf32>
    %67 = tpu.reciprocal %66 {approx = true} : vector<2x8x1xf32> -> vector<2x8x1xf32>
    %68 = vector.broadcast %67 : vector<2x8x1xf32> to vector<2x8x8xf32>
    %69 = arith.mulf %64, %68 : vector<2x8x8xf32>
    %cst_44 = arith.constant 0.000000e+00 : f32
    %70 = vector.shape_cast %49 : vector<1x8x8xi1> to vector<1x8x8xi1>
    %71 = vector.broadcast %70 : vector<1x8x8xi1> to vector<2x8x8xi1>
    %72 = vector.broadcast %cst_44 : f32 to vector<2x8x8xf32>
    %73 = arith.select %71, %69, %72 : vector<2x8x8xi1>, vector<2x8x8xf32>
    %c0_45 = arith.constant 0 : index
    %c0_46 = arith.constant 0 : index
    %c0_47 = arith.constant 0 : index
    %c0_48 = arith.constant 0 : index
    %74 = vector.load %arg20[%c0_45, %c0_46, %c0_47, %c0_48] : memref<2x2x8x8xf32, #tpu.memory_space<vmem>>, vector<2x1x8x8xf32>
    %75 = vector.shape_cast %74 : vector<2x1x8x8xf32> to vector<2x8x8xf32>
    %76 = vector.shape_cast %73 : vector<2x8x8xf32> to vector<2x1x8x8xf32>
    tpu.vector_store %arg20[%c0_45, %c0_46, %c0_47, %c0_48], %76 {strides = array<i32>} : memref<2x2x8x8xf32, #tpu.memory_space<vmem>>, vector<2x1x8x8xf32>,
    %77 = arith.truncf %73 : vector<2x8x8xf32> to vector<2x8x8xbf16>
    "tpu.trace_start"() <{level = 10 : i32, message = "bqk,bkd->bqd"}> : () -> ()
    %cst_49 = arith.constant dense<0.000000e+00> : vector<2x8x16xf32>
    %78 = tpu.matmul %77, %52, %cst_49 {dimension_numbers = #tpu.dot_dimension_numbers<[2], [1], [1], [2], [0, 0, 0, 1, 1, 2], [0], [0]>} : vector<2x8x8xbf16>, vector<2x8x16xbf16>, vector<2x8x16xf32> -> vector<2x8x16xf32>
    "tpu.trace_stop"() : () -> ()
    %79 = arith.truncf %78 : vector<2x8x16xf32> to vector<2x8x16xbf16>
    %c0_50 = arith.constant 0 : index
    %c0_51 = arith.constant 0 : index
    %c0_52 = arith.constant 0 : index
    %80 = vector.load %arg21[%c0_50, %c0_51, %c0_52] : memref<2x8x32xbf16, #tpu.memory_space<vmem>>, vector<2x8x16xbf16>
    tpu.vector_store %arg21[%c0_50, %c0_51, %c0_52], %79 {strides = array<i32>} : memref<2x8x32xbf16, #tpu.memory_space<vmem>>, vector<2x8x16xbf16>,
    %81 = vector.extract_strided_slice %25 {offsets = [0, 0, 16], sizes = [2, 8, 16], strides = [1, 1, 1]} : vector<2x8x32xbf16> to vector<2x8x16xbf16>
    %82 = vector.extract_strided_slice %31 {offsets = [0, 0, 16], sizes = [2, 8, 16], strides = [1, 1, 1]} : vector<2x8x32xbf16> to vector<2x8x16xbf16>
    %83 = vector.extract_strided_slice %37 {offsets = [0, 0, 16], sizes = [2, 8, 16], strides = [1, 1, 1]} : vector<2x8x32xbf16> to vector<2x8x16xbf16>
    "tpu.trace_start"() <{level = 10 : i32, message = "bqd,bkd->bqk"}> : () -> ()
    %cst_53 = arith.constant dense<0.000000e+00> : vector<2x8x8xf32>
    %84 = tpu.matmul %81, %82, %cst_53 {dimension_numbers = #tpu.dot_dimension_numbers<[2], [2], [1], [1], [0, 0, 0, 1, 1, 1], [0], [0]>} : vector<2x8x16xbf16>, vector<2x8x16xbf16>, vector<2x8x8xf32> -> vector<2x8x8xf32>
    "tpu.trace_stop"() : () -> ()
    %cst_54 = arith.constant 2.500000e-01 : f32
    %85 = vector.broadcast %cst_54 : f32 to vector<2x8x8xf32>
    %86 = arith.mulf %84, %85 : vector<2x8x8xf32>
    %cst_55 = arith.constant -1.000000e+32 : f32
    %87 = vector.shape_cast %46 : vector<1x8x8xi1> to vector<1x8x8xi1>
    %88 = vector.broadcast %87 : vector<1x8x8xi1> to vector<2x8x8xi1>
    %89 = vector.broadcast %cst_55 : f32 to vector<2x8x8xf32>
    %90 = arith.select %88, %86, %89 : vector<2x8x8xi1>, vector<2x8x8xf32>
    %cst_56 = arith.constant dense<0xFF800000> : vector<2x8xf32>
    %91 = vector.multi_reduction <maximumf>, %90, %cst_56 [2] : vector<2x8x8xf32> to vector<2x8xf32>
    %92 = vector.shape_cast %91 : vector<2x8xf32> to vector<2x8x1xf32>
    %93 = vector.broadcast %92 : vector<2x8x1xf32> to vector<2x8x8xf32>
    %94 = arith.subf %90, %93 : vector<2x8x8xf32>
    %95 = math.exp %94 : vector<2x8x8xf32>
    %cst_57 = arith.constant dense<0.000000e+00> : vector<2x8xf32>
    %96 = vector.multi_reduction <add>, %95, %cst_57 [2] : vector<2x8x8xf32> to vector<2x8xf32>
    %97 = vector.shape_cast %96 : vector<2x8xf32> to vector<2x8x1xf32>
    %98 = tpu.reciprocal %97 {approx = true} : vector<2x8x1xf32> -> vector<2x8x1xf32>
    %99 = vector.broadcast %98 : vector<2x8x1xf32> to vector<2x8x8xf32>
    %100 = arith.mulf %95, %99 : vector<2x8x8xf32>
    %cst_58 = arith.constant 0.000000e+00 : f32
    %101 = vector.shape_cast %49 : vector<1x8x8xi1> to vector<1x8x8xi1>
    %102 = vector.broadcast %101 : vector<1x8x8xi1> to vector<2x8x8xi1>
    %103 = vector.broadcast %cst_58 : f32 to vector<2x8x8xf32>
    %104 = arith.select %102, %100, %103 : vector<2x8x8xi1>, vector<2x8x8xf32>
    %c0_59 = arith.constant 0 : index
    %c1 = arith.constant 1 : index
    %c0_60 = arith.constant 0 : index
    %c0_61 = arith.constant 0 : index
    %105 = vector.load %arg20[%c0_59, %c1, %c0_60, %c0_61] : memref<2x2x8x8xf32, #tpu.memory_space<vmem>>, vector<2x1x8x8xf32>
    %106 = vector.shape_cast %105 : vector<2x1x8x8xf32> to vector<2x8x8xf32>
    %107 = vector.shape_cast %104 : vector<2x8x8xf32> to vector<2x1x8x8xf32>
    tpu.vector_store %arg20[%c0_59, %c1, %c0_60, %c0_61], %107 {strides = array<i32>} : memref<2x2x8x8xf32, #tpu.memory_space<vmem>>, vector<2x1x8x8xf32>,
    %108 = arith.truncf %104 : vector<2x8x8xf32> to vector<2x8x8xbf16>
    "tpu.trace_start"() <{level = 10 : i32, message = "bqk,bkd->bqd"}> : () -> ()
    %cst_62 = arith.constant dense<0.000000e+00> : vector<2x8x16xf32>
    %109 = tpu.matmul %108, %83, %cst_62 {dimension_numbers = #tpu.dot_dimension_numbers<[2], [1], [1], [2], [0, 0, 0, 1, 1, 2], [0], [0]>} : vector<2x8x8xbf16>, vector<2x8x16xbf16>, vector<2x8x16xf32> -> vector<2x8x16xf32>
    "tpu.trace_stop"() : () -> ()
    %110 = arith.truncf %109 : vector<2x8x16xf32> to vector<2x8x16xbf16>
    %c0_63 = arith.constant 0 : index
    %c0_64 = arith.constant 0 : index
    %c16 = arith.constant 16 : index
    %111 = vector.load %arg21[%c0_63, %c0_64, %c16] : memref<2x8x32xbf16, #tpu.memory_space<vmem>>, vector<2x8x16xbf16>
    tpu.vector_store %arg21[%c0_63, %c0_64, %c16], %110 {strides = array<i32>} : memref<2x8x32xbf16, #tpu.memory_space<vmem>>, vector<2x8x16xbf16>,
    %c0_65 = arith.constant 0 : index
    %c0_66 = arith.constant 0 : index
    %c0_67 = arith.constant 0 : index
    %112 = vector.load %arg21[%c0_65, %c0_66, %c0_67] : memref<2x8x32xbf16, #tpu.memory_space<vmem>>, vector<2x8x32xbf16>
    %113 = vector.shape_cast %112 : vector<2x8x32xbf16> to vector<16x32xbf16>
    %cst_68 = arith.constant dense<0.000000e+00> : vector<16x32xf32>
    %114 = tpu.matmul %113, %4, %cst_68 {dimension_numbers = #tpu.dot_dimension_numbers<[1], [0], [0], [1], [0, 0, 1, 1], [], []>} : vector<16x32xbf16>, vector<32x32xbf16>, vector<16x32xf32> -> vector<16x32xf32>
    %115 = vector.broadcast %5 : vector<1x32xf32> to vector<16x32xf32>
    %116 = arith.addf %114, %115 : vector<16x32xf32>
    %117 = arith.addf %15, %116 : vector<16x32xf32>
    %cst_69 = arith.constant dense<0.000000e+00> : vector<16xf32>
    %118 = vector.multi_reduction <add>, %117, %cst_69 [1] : vector<16x32xf32> to vector<16xf32>
    %119 = vector.shape_cast %118 : vector<16xf32> to vector<16x1xf32>
    %cst_70 = arith.constant 3.200000e+01 : f32
    %120 = vector.broadcast %cst_70 : f32 to vector<16x1xf32>
    %121 = arith.divf %119, %120 : vector<16x1xf32>
    %122 = vector.broadcast %121 : vector<16x1xf32> to vector<16x32xf32>
    %123 = arith.subf %117, %122 : vector<16x32xf32>
    %124 = arith.mulf %123, %123 : vector<16x32xf32>
    %cst_71 = arith.constant dense<0.000000e+00> : vector<16xf32>
    %125 = vector.multi_reduction <add>, %124, %cst_71 [1] : vector<16x32xf32> to vector<16xf32>
    %126 = vector.shape_cast %125 : vector<16xf32> to vector<16x1xf32>
    %cst_72 = arith.constant 3.200000e+01 : f32
    %127 = vector.broadcast %cst_72 : f32 to vector<16x1xf32>
    %128 = arith.divf %126, %127 : vector<16x1xf32>
    %129 = vector.broadcast %121 : vector<16x1xf32> to vector<16x32xf32>
    %130 = arith.subf %117, %129 : vector<16x32xf32>
    %cst_73 = arith.constant 9.99999974E-6 : f32
    %131 = vector.broadcast %cst_73 : f32 to vector<16x1xf32>
    %132 = arith.addf %128, %131 : vector<16x1xf32>
    %133 = math.rsqrt %132 : vector<16x1xf32>
    %134 = vector.broadcast %133 : vector<16x1xf32> to vector<16x32xf32>
    %135 = arith.mulf %130, %134 : vector<16x32xf32>
    %136 = vector.broadcast %6 : vector<1x32xf32> to vector<16x32xf32>
    %137 = arith.mulf %135, %136 : vector<16x32xf32>
    %138 = vector.broadcast %7 : vector<1x32xf32> to vector<16x32xf32>
    %139 = arith.addf %137, %138 : vector<16x32xf32>
    %140 = arith.truncf %139 : vector<16x32xf32> to vector<16x32xbf16>
    %cst_74 = arith.constant dense<0.000000e+00> : vector<16x64xf32>
    %141 = tpu.matmul %140, %8, %cst_74 {dimension_numbers = #tpu.dot_dimension_numbers<[1], [0], [0], [1], [0, 0, 1, 1], [], []>} : vector<16x32xbf16>, vector<32x64xbf16>, vector<16x64xf32> -> vector<16x64xf32>
    %142 = vector.broadcast %9 : vector<1x64xf32> to vector<16x64xf32>
    %143 = arith.addf %141, %142 : vector<16x64xf32>
    %cst_75 = arith.constant 0.707106769 : f32
    %144 = vector.broadcast %cst_75 : f32 to vector<16x64xf32>
    %145 = arith.mulf %143, %144 : vector<16x64xf32>
    %cst_76 = arith.constant 0.000000e+00 : f32
    %146 = vector.broadcast %cst_76 : f32 to vector<16x64xf32>
    %147 = arith.cmpf oge, %145, %146 : vector<16x64xf32>
    %cst_77 = arith.constant 1.000000e+00 : f32
    %cst_78 = arith.constant -1.000000e+00 : f32
    %148 = vector.broadcast %cst_77 : f32 to vector<16x64xf32>
    %149 = vector.broadcast %cst_78 : f32 to vector<16x64xf32>
    %150 = arith.select %147, %148, %149 : vector<16x64xi1>, vector<16x64xf32>
    %151 = math.absf %145 : vector<16x64xf32>
    %cst_79 = arith.constant 0.327591091 : f32
    %152 = vector.broadcast %cst_79 : f32 to vector<16x64xf32>
    %153 = arith.mulf %152, %151 : vector<16x64xf32>
    %cst_80 = arith.constant 1.000000e+00 : f32
    %154 = vector.broadcast %cst_80 : f32 to vector<16x64xf32>
    %155 = arith.addf %154, %153 : vector<16x64xf32>
    %156 = tpu.reciprocal %155 {approx = true} : vector<16x64xf32> -> vector<16x64xf32>
    %cst_81 = arith.constant 1.06140542 : f32
    %157 = vector.broadcast %cst_81 : f32 to vector<16x64xf32>
    %158 = arith.mulf %156, %157 : vector<16x64xf32>
    %cst_82 = arith.constant -1.45315206 : f32
    %159 = vector.broadcast %cst_82 : f32 to vector<16x64xf32>
    %160 = arith.addf %159, %158 : vector<16x64xf32>
    %161 = arith.mulf %156, %160 : vector<16x64xf32>
    %cst_83 = arith.constant 1.42141378 : f32
    %162 = vector.broadcast %cst_83 : f32 to vector<16x64xf32>
    %163 = arith.addf %162, %161 : vector<16x64xf32>
    %164 = arith.mulf %156, %163 : vector<16x64xf32>
    %cst_84 = arith.constant -0.284496725 : f32
    %165 = vector.broadcast %cst_84 : f32 to vector<16x64xf32>
    %166 = arith.addf %165, %164 : vector<16x64xf32>
    %167 = arith.mulf %156, %166 : vector<16x64xf32>
    %cst_85 = arith.constant 0.254829586 : f32
    %168 = vector.broadcast %cst_85 : f32 to vector<16x64xf32>
    %169 = arith.addf %168, %167 : vector<16x64xf32>
    %170 = arith.mulf %156, %169 : vector<16x64xf32>
    %cst_86 = arith.constant 0.000000e+00 : f32
    %171 = vector.broadcast %cst_86 : f32 to vector<16x64xf32>
    %172 = arith.subf %171, %151 : vector<16x64xf32>
    %173 = arith.mulf %172, %151 : vector<16x64xf32>
    %174 = math.exp %173 : vector<16x64xf32>
    %175 = arith.mulf %170, %174 : vector<16x64xf32>
    %cst_87 = arith.constant 1.000000e+00 : f32
    %176 = vector.broadcast %cst_87 : f32 to vector<16x64xf32>
    %177 = arith.subf %176, %175 : vector<16x64xf32>
    %178 = arith.mulf %150, %177 : vector<16x64xf32>
    %cst_88 = arith.constant 5.000000e-01 : f32
    %179 = vector.broadcast %cst_88 : f32 to vector<16x64xf32>
    %180 = arith.mulf %179, %143 : vector<16x64xf32>
    %cst_89 = arith.constant 1.000000e+00 : f32
    %181 = vector.broadcast %cst_89 : f32 to vector<16x64xf32>
    %182 = arith.addf %181, %178 : vector<16x64xf32>
    %183 = arith.mulf %180, %182 : vector<16x64xf32>
    %184 = arith.truncf %183 : vector<16x64xf32> to vector<16x64xbf16>
    %cst_90 = arith.constant dense<0.000000e+00> : vector<16x32xf32>
    %185 = tpu.matmul %184, %10, %cst_90 {dimension_numbers = #tpu.dot_dimension_numbers<[1], [0], [0], [1], [0, 0, 1, 1], [], []>} : vector<16x64xbf16>, vector<64x32xbf16>, vector<16x32xf32> -> vector<16x32xf32>
    %186 = vector.broadcast %11 : vector<1x32xf32> to vector<16x32xf32>
    %187 = arith.addf %185, %186 : vector<16x32xf32>
    %188 = arith.addf %139, %187 : vector<16x32xf32>
    %cst_91 = arith.constant dense<0.000000e+00> : vector<16xf32>
    %189 = vector.multi_reduction <add>, %188, %cst_91 [1] : vector<16x32xf32> to vector<16xf32>
    %190 = vector.shape_cast %189 : vector<16xf32> to vector<16x1xf32>
    %cst_92 = arith.constant 3.200000e+01 : f32
    %191 = vector.broadcast %cst_92 : f32 to vector<16x1xf32>
    %192 = arith.divf %190, %191 : vector<16x1xf32>
    %193 = vector.broadcast %192 : vector<16x1xf32> to vector<16x32xf32>
    %194 = arith.subf %188, %193 : vector<16x32xf32>
    %195 = arith.mulf %194, %194 : vector<16x32xf32>
    %cst_93 = arith.constant dense<0.000000e+00> : vector<16xf32>
    %196 = vector.multi_reduction <add>, %195, %cst_93 [1] : vector<16x32xf32> to vector<16xf32>
    %197 = vector.shape_cast %196 : vector<16xf32> to vector<16x1xf32>
    %cst_94 = arith.constant 3.200000e+01 : f32
    %198 = vector.broadcast %cst_94 : f32 to vector<16x1xf32>
    %199 = arith.divf %197, %198 : vector<16x1xf32>
    %200 = vector.broadcast %192 : vector<16x1xf32> to vector<16x32xf32>
    %201 = arith.subf %188, %200 : vector<16x32xf32>
    %cst_95 = arith.constant 9.99999974E-6 : f32
    %202 = vector.broadcast %cst_95 : f32 to vector<16x1xf32>
    %203 = arith.addf %199, %202 : vector<16x1xf32>
    %204 = math.rsqrt %203 : vector<16x1xf32>
    %205 = vector.broadcast %204 : vector<16x1xf32> to vector<16x32xf32>
    %206 = arith.mulf %201, %205 : vector<16x32xf32>
    %207 = vector.broadcast %12 : vector<1x32xf32> to vector<16x32xf32>
    %208 = arith.mulf %206, %207 : vector<16x32xf32>
    %209 = vector.broadcast %13 : vector<1x32xf32> to vector<16x32xf32>
    %210 = arith.addf %208, %209 : vector<16x32xf32>
    %211 = vector.shape_cast %210 : vector<16x32xf32> to vector<2x8x32xf32>
    %c0_96 = arith.constant 0 : index
    %c0_97 = arith.constant 0 : index
    %c0_98 = arith.constant 0 : index
    %212 = vector.load %arg19[%c0_96, %c0_97, %c0_98] : memref<2x8x32xf32, #tpu.memory_space<vmem>>, vector<2x8x32xf32>
    tpu.vector_store %arg19[%c0_96, %c0_97, %c0_98], %211 {strides = array<i32>} : memref<2x8x32xf32, #tpu.memory_space<vmem>>, vector<2x8x32xf32>,
    return
  }
  func.func @transform_0(%arg0: i32, %arg1: i32) -> (i32, i32, i32) {
    %c0_i32 = arith.constant 0 : i32
    %c0_i32_0 = arith.constant 0 : i32
    return %arg0, %arg1, %c0_i32 : i32, i32, i32
  }
  func.func @transform_1(%arg0: i32, %arg1: i32) -> (i32, i32, i32) {
    %c0_i32 = arith.constant 0 : i32
    %c0_i32_0 = arith.constant 0 : i32
    %c0_i32_1 = arith.constant 0 : i32
    return %arg0, %c0_i32, %c0_i32_0 : i32, i32, i32
  }
  func.func @transform_2(%arg0: i32, %arg1: i32) -> (i32, i32, i32) {
    %c0_i32 = arith.constant 0 : i32
    %c0_i32_0 = arith.constant 0 : i32
    %c0_i32_1 = arith.constant 0 : i32
    return %arg0, %c0_i32, %c0_i32_0 : i32, i32, i32
  }
  func.func @transform_3(%arg0: i32, %arg1: i32) -> (i32, i32) {
    %c0_i32 = arith.constant 0 : i32
    %c0_i32_0 = arith.constant 0 : i32
    %c0_i32_1 = arith.constant 0 : i32
    return %c0_i32, %c0_i32_0 : i32, i32
  }
  func.func @transform_4(%arg0: i32, %arg1: i32) -> (i32, i32) {
    %c0_i32 = arith.constant 0 : i32
    %c0_i32_0 = arith.constant 0 : i32
    %c0_i32_1 = arith.constant 0 : i32
    return %c0_i32, %c0_i32_0 : i32, i32
  }
  func.func @transform_5(%arg0: i32, %arg1: i32) -> (i32, i32) {
    %c0_i32 = arith.constant 0 : i32
    %c0_i32_0 = arith.constant 0 : i32
    %c0_i32_1 = arith.constant 0 : i32
    return %c0_i32, %c0_i32_0 : i32, i32
  }
  func.func @transform_6(%arg0: i32, %arg1: i32) -> (i32, i32) {
    %c0_i32 = arith.constant 0 : i32
    %c0_i32_0 = arith.constant 0 : i32
    %c0_i32_1 = arith.constant 0 : i32
    return %c0_i32, %c0_i32_0 : i32, i32
  }
  func.func @transform_7(%arg0: i32, %arg1: i32) -> (i32, i32) {
    %c0_i32 = arith.constant 0 : i32
    %c0_i32_0 = arith.constant 0 : i32
    %c0_i32_1 = arith.constant 0 : i32
    return %c0_i32, %c0_i32_0 : i32, i32
  }
  func.func @transform_8(%arg0: i32, %arg1: i32) -> (i32, i32) {
    %c0_i32 = arith.constant 0 : i32
    %c0_i32_0 = arith.constant 0 : i32
    %c0_i32_1 = arith.constant 0 : i32
    return %c0_i32, %c0_i32_0 : i32, i32
  }
  func.func @transform_9(%arg0: i32, %arg1: i32) -> (i32, i32) {
    %c0_i32 = arith.constant 0 : i32
    %c0_i32_0 = arith.constant 0 : i32
    %c0_i32_1 = arith.constant 0 : i32
    return %c0_i32, %c0_i32_0 : i32, i32
  }
  func.func @transform_10(%arg0: i32, %arg1: i32) -> (i32, i32) {
    %c0_i32 = arith.constant 0 : i32
    %c0_i32_0 = arith.constant 0 : i32
    %c0_i32_1 = arith.constant 0 : i32
    return %c0_i32, %c0_i32_0 : i32, i32
  }
  func.func @transform_11(%arg0: i32, %arg1: i32) -> (i32, i32) {
    %c0_i32 = arith.constant 0 : i32
    %c0_i32_0 = arith.constant 0 : i32
    %c0_i32_1 = arith.constant 0 : i32
    return %c0_i32, %c0_i32_0 : i32, i32
  }
  func.func @transform_12(%arg0: i32, %arg1: i32) -> (i32, i32) {
    %c0_i32 = arith.constant 0 : i32
    %c0_i32_0 = arith.constant 0 : i32
    %c0_i32_1 = arith.constant 0 : i32
    return %c0_i32, %c0_i32_0 : i32, i32
  }
  func.func @transform_13(%arg0: i32, %arg1: i32) -> (i32, i32) {
    %c0_i32 = arith.constant 0 : i32
    %c0_i32_0 = arith.constant 0 : i32
    %c0_i32_1 = arith.constant 0 : i32
    return %c0_i32, %c0_i32_0 : i32, i32
  }
  func.func @transform_14(%arg0: i32, %arg1: i32) -> (i32, i32) {
    %c0_i32 = arith.constant 0 : i32
    %c0_i32_0 = arith.constant 0 : i32
    %c0_i32_1 = arith.constant 0 : i32
    return %c0_i32, %c0_i32_0 : i32, i32
  }
  func.func @transform_15(%arg0: i32, %arg1: i32) -> (i32, i32) {
    %c0_i32 = arith.constant 0 : i32
    %c0_i32_0 = arith.constant 0 : i32
    %c0_i32_1 = arith.constant 0 : i32
    return %c0_i32, %c0_i32_0 : i32, i32
  }
  func.func @transform_16(%arg0: i32, %arg1: i32) -> (i32, i32) {
    %c0_i32 = arith.constant 0 : i32
    %c0_i32_0 = arith.constant 0 : i32
    %c0_i32_1 = arith.constant 0 : i32
    return %c0_i32, %c0_i32_0 : i32, i32
  }
  func.func @transform_17(%arg0: i32, %arg1: i32) -> (i32, i32, i32) {
    %c0_i32 = arith.constant 0 : i32
    %c0_i32_0 = arith.constant 0 : i32
    return %arg0, %arg1, %c0_i32 : i32, i32, i32
  }
  func.func @transform_18(%arg0: i32, %arg1: i32) -> (i32, i32, i32, i32) {
    %c0_i32 = arith.constant 0 : i32
    %c0_i32_0 = arith.constant 0 : i32
    %c0_i32_1 = arith.constant 0 : i32
    return %arg0, %c0_i32, %arg1, %c0_i32_0 : i32, i32, i32, i32
  }
}

</mosaic_0001>

<bundles_post_ra>
// kernel: tpu_custom_call.1
= control target key start
LH: loop header
LB: loop body
LE: loop exit
PB: predicated region body
PF: predicated region fallthrough
CT: control target
= control target key end

     0   :  { %s2068_s0 = inlined_call_operand.vmem [shape: f32[2,8,32], index: 0, kind: input, shape index: {}]   ;;  %s2069_s1 = inlined_call_operand.vmem [shape: f32[2,8,32], index: 1, kind: input, shape index: {}]   ;;  %s2070_s2 = inlined_call_operand.vmem [shape: f32[2,8,32], index: 2, kind: input, shape index: {}]   ;;  %s2071_s3 = inlined_call_operand.hbm [shape: bf16[32,32], index: 3, kind: input, shape index: {}]   ;;  %s2072_s4 = inlined_call_operand.vmem [shape: f32[1,32], index: 4, kind: input, shape index: {}]   ;;  %s2073_s5 = inlined_call_operand.hbm [shape: bf16[32,32], index: 5, kind: input, shape index: {}]   ;;  %s2074_s6 = inlined_call_operand.vmem [shape: f32[1,32], index: 6, kind: input, shape index: {}]   ;;  %s2075_s7 = inlined_call_operand.hbm [shape: bf16[32,32], index: 7, kind: input, shape index: {}]   ;;  %s2076_s8 = inlined_call_operand.hbm [shape: f32[1,32], index: 8, kind: input, shape index: {}]   ;;  %s2077_s9 = inlined_call_operand.hbm [shape: f32[1,32], index: 9, kind: input, shape index: {}]   ;;  %s2078_s10 = inlined_call_operand.vmem [shape: f32[1,32], index: 10, kind: input, shape index: {}]   ;;  %s2079_s11 = inlined_call_operand.vmem [shape: bf16[32,64], index: 11, kind: input, shape index: {}]   ;;  %s2080_s12 = inlined_call_operand.vmem [shape: f32[1,64], index: 12, kind: input, shape index: {}]   ;;  %s2081_s13 = inlined_call_operand.vmem [shape: bf16[64,32], index: 13, kind: input, shape index: {}]   ;;  %s2082_s14 = inlined_call_operand.vmem [shape: f32[1,32], index: 14, kind: input, shape index: {}]   ;;  %s2083_s15 = inlined_call_operand.vmem [shape: f32[1,32], index: 15, kind: input, shape index: {}]   ;;  %s2084_s16 = inlined_call_operand.vmem [shape: f32[1,32], index: 16, kind: input, shape index: {}]   ;;  %s2085_s17 = inlined_call_operand.hbm [shape: f32[2,8,32], index: 17, kind: output, shape index: {0}]   ;;  %s2086_s18 = inlined_call_operand.hbm [shape: f32[2,2,8,8], index: 18, kind: output, shape index: {1}]  }
   0x1   :  { %2090 = sst [smem:[#allocation20_spill]] %s2068_s0 }
   0x2   :  { %2091 = sst [smem:[#allocation21_spill]] %s2069_s1 }
   0x3   :  { %2092 = sst [smem:[#allocation22_spill]] %s2070_s2 }
   0x4   :  { %24 = vsyncpa [#allocation4], 0 }
   0x5   :  { %25 = vsyncpa [#allocation7], 0 }
   0x6   :  { %26 = vsyncpa [#allocation10], 0 }
   0x7   :  { %27 = vsyncpa [#allocation5], 0 }
   0x8   :  { %28 = vsyncpa [#allocation14], 0  ;;  %s1636_s27 = smov [#allocation6]   ;;  %s1637_s29 = smov [#allocation9]  }
   0x9   :  { %s54_s28 = sshll.u32 %s1636_s27, 4  ;;  %s81_s30 = sshll.u32 %s1637_s29, 4  ;;  %s55_s28 = int_to_ptr.vmem [resolvable:$true] %s54_s28  ;;  %s1747_s30 = int_to_ptr.vmem [resolvable:$true] %s81_s30 }
   0xa   :  { %s1472_s1 = scalar_lea.hbm %s2073_s5, 256 }
   0xb   :  { %p1473_p0 = scmp.ne.s32.totalorder %s2073_s5, %s1472_s1  ;;  %p1476_p1 = scmp.lt.u32.totalorder %s1472_s1, %s2073_s5 }
   0xd   :  { %p1478_p2 = pnand %p1476_p1, %p1473_p0 }
   0xf   :  { %1481 = shalt.err (!%p1478_p2)
}
  0x10   :  { %s1482_s23 = scalar_lea.vmem %s55_s28, 256  ;;  %p1487_p4 = scmp.lt.s32.totalorder %s55_s28, %s55_s28 }
  0x11   :  { %p1483_p3 = scmp.ne.s32.totalorder %s55_s28, %s1482_s23  ;;  %p1488_p5 = scmp.lt.s32.totalorder %s1482_s23, %s1482_s23 }
  0x13   :  { %p1489_p6 = por %p1488_p5, %p1487_p4 }
  0x15   :  { %p1490_p7 = pnand %p1489_p6, %p1483_p3 }
  0x17   :  { %1493 = shalt.err (!%p1490_p7)
}
  0x18   :  { %s1638_s24 = smov 64   ;;  %s1639_s25 = smov 4  }
  0x19   :  { %60 = dma.hbm_to_vmem [thread:$0]  %s2073_s5, 256, %s55_s28, [#allocation7], %s1638_s24, %s1638_s24, %s1639_s25  }
  0x1a   :  { %s1494_s19 = scalar_lea.hbm %s2076_s8, 16 }
  0x1b   :  { %p1495_p8 = scmp.ne.s32.totalorder %s2076_s8, %s1494_s19  ;;  %p1498_p9 = scmp.lt.u32.totalorder %s1494_s19, %s2076_s8 }
  0x1d   :  { %p1500_p10 = pnand %p1498_p9, %p1495_p8 }
  0x1f   :  { %1503 = shalt.err (!%p1500_p10)
}
  0x20   :  { %s1504_s2 = scalar_lea.vmem %s1747_s30, 16  ;;  %s1508_s5 = scalar_lea.vmem %s1747_s30, 32 }
  0x21   :  { %p1505_p11 = scmp.ne.s32.totalorder %s1747_s30, %s1504_s2  ;;  %p1509_p12 = scmp.lt.s32.totalorder %s1747_s30, %s1747_s30 }
  0x22   :  { %p1510_p13 = scmp.lt.s32.totalorder %s1508_s5, %s1504_s2 }
  0x24   :  { %p1511_p0 = por %p1510_p13, %p1509_p12 }
  0x26   :  { %p1512_p1 = pnand %p1511_p0, %p1505_p11 }
  0x28   :  { %1515 = shalt.err (!%p1512_p1)
}
  0x29   :  { %84 = dma.hbm_to_vmem [thread:$0]  %s2076_s8, 16, %s1747_s30, [#allocation10]  }
  0x2a   :  { %s1640_s26 = smov [#allocation3]   ;;  %s1641_s29 = smov [#allocation8]  }
  0x2b   :  { %s40_s27 = sshll.u32 %s1640_s26, 4  ;;  %s68_s0 = sshll.u32 %s1641_s29, 4  ;;  %s41_s27 = int_to_ptr.vmem [resolvable:$true] %s40_s27  ;;  %s1782_s0 = int_to_ptr.vmem [resolvable:$true] %s68_s0 }
  0x2c   :  { %s1516_s20 = scalar_lea.hbm %s2071_s3, 256 }
  0x2d   :  { %p1517_p2 = scmp.ne.s32.totalorder %s2071_s3, %s1516_s20  ;;  %p1520_p3 = scmp.lt.u32.totalorder %s1516_s20, %s2071_s3 }
  0x2f   :  { %p1522_p4 = pnand %p1520_p3, %p1517_p2 }
  0x31   :  { %1525 = shalt.err (!%p1522_p4)
}
  0x32   :  { %s1526_s8 = scalar_lea.vmem %s41_s27, 256  ;;  %p1531_p6 = scmp.lt.s32.totalorder %s41_s27, %s41_s27 }
  0x33   :  { %p1527_p5 = scmp.ne.s32.totalorder %s41_s27, %s1526_s8  ;;  %p1532_p7 = scmp.lt.s32.totalorder %s1526_s8, %s1526_s8 }
  0x35   :  { %p1533_p8 = por %p1532_p7, %p1531_p6 }
  0x37   :  { %p1534_p9 = pnand %p1533_p8, %p1527_p5 }
  0x39   :  { %1537 = shalt.err (!%p1534_p9)
}
  0x3a   :  { %46 = dma.hbm_to_vmem [thread:$0]  %s2071_s3, 256, %s41_s27, [#allocation4], %s1638_s24, %s1638_s24, %s1639_s25  }
  0x3b   :  { %s1538_s29 = scalar_lea.hbm %s2075_s7, 256 }
  0x3c   :  { %p1539_p10 = scmp.ne.s32.totalorder %s2075_s7, %s1538_s29  ;;  %p1542_p11 = scmp.lt.u32.totalorder %s1538_s29, %s2075_s7 }
  0x3e   :  { %p1544_p12 = pnand %p1542_p11, %p1539_p10 }
  0x40   :  { %1547 = shalt.err (!%p1544_p12)
}
  0x41   :  { %s1548_s22 = scalar_lea.vmem %s1782_s0, 256  ;;  %p1553_p0 = scmp.lt.s32.totalorder %s1782_s0, %s1782_s0 }
  0x42   :  { %p1549_p13 = scmp.ne.s32.totalorder %s1782_s0, %s1548_s22  ;;  %p1554_p1 = scmp.lt.s32.totalorder %s1548_s22, %s1548_s22 }
  0x44   :  { %p1555_p2 = por %p1554_p1, %p1553_p0 }
  0x46   :  { %p1556_p3 = pnand %p1555_p2, %p1549_p13 }
  0x48   :  { %1559 = shalt.err (!%p1556_p3)
}
  0x49   :  { %74 = dma.hbm_to_vmem [thread:$0]  %s2075_s7, 256, %s1782_s0, [#allocation7], %s1638_s24, %s1638_s24, %s1639_s25  }
  0x4a   :  { %s1642_s2 = smov [#allocation11]   ;;  %s1560_s28 = scalar_lea.hbm %s2077_s9, 16 }
  0x4b   :  { %s91_s5 = sshll.u32 %s1642_s2, 4  ;;  %p1561_p4 = scmp.ne.s32.totalorder %s2077_s9, %s1560_s28  ;;  %s92_s5 = int_to_ptr.vmem [resolvable:$true] %s91_s5 }
  0x4c   :  { %p1564_p5 = scmp.lt.u32.totalorder %s1560_s28, %s2077_s9 }
  0x4e   :  { %p1566_p6 = pnand %p1564_p5, %p1561_p4 }
  0x50   :  { %1569 = shalt.err (!%p1566_p6)
}
  0x51   :  { %s1570_s1 = scalar_lea.vmem %s92_s5, 16  ;;  %s1574_s7 = scalar_lea.vmem %s92_s5, 32 }
  0x52   :  { %p1571_p7 = scmp.ne.s32.totalorder %s92_s5, %s1570_s1  ;;  %p1575_p8 = scmp.lt.s32.totalorder %s92_s5, %s92_s5 }
  0x53   :  { %p1576_p9 = scmp.lt.s32.totalorder %s1574_s7, %s1570_s1 }
  0x55   :  { %p1577_p10 = por %p1576_p9, %p1575_p8 }
  0x57   :  { %p1578_p11 = pnand %p1577_p10, %p1571_p7 }
  0x59   :  { %1581 = shalt.err (!%p1578_p11)
}
  0x5a   :  { %94 = dma.hbm_to_vmem [thread:$0]  %s2077_s9, 16, %s92_s5, [#allocation10]  }
  0x5b   :  { %1626 = dma.done.wait [#allocation4], 256  }
  0x5c   :  { %1627 = vsyncadd [#allocation4], 4294967040 }
  0x5d   :  { %1628 = dma.done.wait [#allocation7], 512  }
  0x5e   :  { %1629 = vsyncadd [#allocation7], 4294966784 }
  0x5f   :  { %1630 = dma.done.wait [#allocation10], 32  }
  0x60   :  { %1631 = vsyncadd [#allocation10], 4294967264  ;;  %v1643_v0 = vmov 0.0   ;;  %vm1644_vm0 = vmmov 0   ;;  %v1427_v1 = vld [vmem:[#allocation3] sm:$0xff]   ;;  %v1428_v2 = vld [vmem:[#allocation3 + $0x8] sm:$0xff]   ;;  %v355_v44 = vlaneseq }
  0x61   :  { %1319 = vmatprep.subr.bf16.mxu1 %v1643_v0  ;;  %1311 = vmatprep.subr.bf16.mxu0 %v1643_v0  ;;  %s2093_s20 = sld [smem:[#allocation21_spill]]  ;;  %s2094_s2 = sld [smem:[#allocation20_spill]]  ;;  %vm183_vm1 = vcmask 261120   ;;  %v1429_v9 = vld [vmem:[#allocation6] sm:$0xff]   ;;  %v1430_v10 = vld [vmem:[#allocation6 + $0x8] sm:$0xff]   ;;  %vm363_vm2 = vcmask 130048  }
  0x62   :  { %1323 = vmatprep.mubr.msk.bf16.mxu1 %vm1644_vm0, %v1643_v0  ;;  %1315 = vmatprep.mubr.msk.bf16.mxu0 %vm1644_vm0, %v1643_v0  ;;  %s2095_s23 = sld [smem:[#allocation22_spill]]  ;;  %v1223_v14 = vld [vmem:[%s2072_s4] ss:$0 sm:$0xff]  ;;  %s1645_s4 = smov 112   ;;  %vm496_vm3 = vcmask 1043456   ;;  %v1903_v45 = vshrl.u32 %v355_v44, 7 }
  0x63   :  { %1320 = vmatpush3.bf16.msra.mxu1 %v1427_v1  ;;  %1312 = vmatpush3.bf16.msra.mxu0 %v1427_v1  ;;  %v1232_v33 = vld [vmem:[%s2074_s6] ss:$0 sm:$0xff]  ;;  %v1905_v46 = vand.u32 127, %v355_v44  ;;  %vm462_vm5 = vcmask 64512   ;;  %vm588_vm7 = vcmask 125952   ;;  %s1646_s6 = smov 16  }
  0x64   :  { %1321 = vmatprep.subr.bf16.mxu1 %v1643_v0  ;;  %1313 = vmatprep.subr.bf16.mxu0 %v1643_v0  ;;  %vm362_vm6 = vcmp.ne.s32.totalorder %v1903_v45, 0  ;;  %vm834_vm8 = vcmask 257152   ;;  %vm1097_vm11 = vcmask 523264  }
  0x65   :  { %vm361_vm4 = vcmp.lt.s32.totalorder %v1905_v46, %v1903_v45 }
  0x67   :  { %v160_v3 = vld [vmem:[%s2093_s20] sm:$0xff]  ;;  %v161_v4 = vld [vmem:[%s2093_s20 + $0x8] sm:$0xff]  ;;  %1322 = vmatpush3.bf16.msra.mxu1 %v1428_v2  ;;  %1314 = vmatpush3.bf16.msra.mxu0 %v1428_v2 }
  0x68   :  { %v1846_v5 = vld [vmem:[%s2094_s2] sm:$0xff]  ;;  %v1853_v6 = vld [vmem:[%s2094_s2 + $0x8] sm:$0xff]  ;;  %v234_v7 = vpack.c.bf16 %v161_v4, %v160_v3  ;;  %1327 = vmatprep.subr.bf16.mxu0 %v1643_v0  ;;  %1335 = vmatprep.subr.bf16.mxu1 %v1643_v0 }
  0x69   :  { %v164_v8 = vpack.c.bf16 %v1853_v6, %v1846_v5  ;;  %v162_v11 = vld [vmem:[%s2095_s23] sm:$0xff]  ;;  %v163_v12 = vld [vmem:[%s2095_s23 + $0x8] sm:$0xff] }
  0x6a   :  { %1324 = vmatmul.mubr.msk.bf16.vlgmr.msra.gmra.mrb[0].mxu1 %vm183_vm1, %v234_v7  ;;  %v285_v13 = vpack.c.bf16 %v163_v12, %v162_v11 }
  0x6b   :  { %1316 = vmatmul.mubr.msk.bf16.vlgmr.msra.gmra.mrb[0].mxu0 %vm183_vm1, %v164_v8  ;;  %1337 = vmatprep.mubr.msk.bf16.mxu1 %vm1644_vm0, %v1643_v0 }
  0x6c   :  { %1328 = vmatpush3.bf16.msra.mxu0 %v1429_v9  ;;  %1331 = vmatprep.mubr.msk.bf16.mxu0 %vm1644_vm0, %v1643_v0 }
  0x6d   :  { %1329 = vmatprep.subr.bf16.mxu0 %v1643_v0 }
  0x70   :  { %1330 = vmatpush3.bf16.msra.mxu0 %v1430_v10 }
  0x71   :  { %1341 = vmatprep.subr.bf16.mxu0 %v1643_v0 }
  0x73   :  { %1332 = vmatmul.mubr.msk.bf16.vlgmr.msra.gmra.mrb[4].mxu0 %vm183_vm1, %v285_v13 }
  0x74   :  { %1343 = vmatprep.mubr.msk.bf16.mxu0 %vm1644_vm0, %v1643_v0 }
 0x13d   :  { %v272_v15 = vpop.f32.mrb[0].mxu1 }
 0x13e   :  { %v221_v16 = vpop.f32.mrb[0].mxu0  ;;  %v273_v17 = vadd.f32 %v1223_v14, %v272_v15  ;;  %v1325_v18 = vpop.f32.mrb[1].mxu1 }
 0x13f   :  { %v1317_v19 = vpop.f32.mrb[1].mxu0  ;;  %v275_v20 = vpop.f32.mrb[2].mxu1  ;;  %v222_v28 = vadd.f32 %v1223_v14, %v221_v16 }
 0x140   :  { %v224_v21 = vpop.f32.mrb[2].mxu0  ;;  %v1269_v22 = vpack.c.bf16 %v273_v17, %v273_v17  ;;  %v276_v23 = vadd.f32 %v1223_v14, %v275_v20  ;;  %v1326_v24 = vpop.f32.mrb[3].mxu1 }
 0x141   :  { %v1318_v25 = vpop.f32.mrb[3].mxu0  ;;  %v1267_v30 = vpack.c.bf16 %v222_v28, %v222_v28  ;;  %v225_v31 = vadd.f32 %v1223_v14, %v224_v21 }
 0x142   :  { %v368_v26 = vsel %vm363_vm2, %v1269_v22, 0  ;;  %v1270_v27 = vpack.c.bf16 %v276_v23, %v276_v23 }
 0x143   :  { %1336 = vmatpush3.bf16.xpose.msra.mxu1 %v368_v26  ;;  %v1268_v32 = vpack.c.bf16 %v225_v31, %v225_v31 }
 0x144   :  { %v414_v29 = vsel %vm363_vm2, %v1270_v27, 0  ;;  %643 = vrot.lane.b32.xlu1 %v1270_v27, %s1645_s4  ;;  %1347 = vmatprep.subr.bf16.mxu1 %v1643_v0 }
 0x145   :  { %1342 = vmatpush3.bf16.xpose.msra.mxu0 %v414_v29 }
 0x146   :  { %1353 = vmatprep.subr.bf16.mxu0 %v1643_v0  ;;  %v341_v34 = vpop.f32.mrb[4].mxu0 }
 0x147   :  { %v342_v35 = vadd.f32 %v1232_v33, %v341_v34  ;;  %v1333_v36 = vpop.f32.mrb[5].mxu0 }
 0x148   :  { %v344_v37 = vpop.f32.mrb[6].mxu0 }
 0x149   :  { %v1893_v38 = vpack.c.bf16 %v342_v35, %v342_v35  ;;  %v345_v39 = vadd.f32 %v1232_v33, %v344_v37  ;;  %v1334_v40 = vpop.f32.mrb[7].mxu0 }
 0x14a   :  { %1338 = vmatmul.mubr.msk.bf16.vlgmr.msra.gmra.mrb[4].mxu1 %vm363_vm2, %v1267_v30 }
 0x14b   :  { %1349 = vmatprep.mubr.msk.bf16.mxu1 %vm1644_vm0, %v1643_v0  ;;  %v498_v41 = vsel %vm496_vm3, %v1893_v38, 0  ;;  %v1897_v42 = vpack.c.bf16 %v345_v39, %v345_v39 }
 0x14c   :  { %1344 = vmatmul.mubr.msk.bf16.vlgmr.msra.gmra.mrb[8].mxu0 %vm363_vm2, %v1268_v32  ;;  %1348 = vmatpush3.bf16.msra.mxu1 %v498_v41 }
 0x14d   :  { %1355 = vmatprep.mubr.msk.bf16.mxu0 %vm1644_vm0, %v1643_v0  ;;  %v544_v43 = vsel %vm496_vm3, %v1897_v42, 0  ;;  %1359 = vmatprep.subr.bf16.mxu1 %v1643_v0 }
 0x14e   :  { %1354 = vmatpush3.bf16.msra.mxu0 %v544_v43 }
 0x14f   :  { %1365 = vmatprep.subr.bf16.mxu0 %v1643_v0 }
 0x1b6   :  { %v644_v10 = vpop.permute.xlu1 %643 }
 0x1b7   :  { %v649_v23 = vsel %vm363_vm2, %v644_v10, 0 }
 0x21d   :  { %v404_v47 = vpop.f32.mrb[4].mxu1 }
 0x21e   :  { %v456_v48 = vmul.f32 0.25, %v404_v47  ;;  %v1339_v49 = vpop.f32.mrb[5].mxu1 }
 0x21f   :  { %v407_v50 = vpop.f32.mrb[6].mxu1  ;;  %v450_v51 = vpop.f32.mrb[8].mxu0 }
 0x220   :  { %v457_v52 = vmul.f32 0.25, %v450_v51  ;;  %v1340_v53 = vpop.f32.mrb[7].mxu1  ;;  %v1345_v54 = vpop.f32.mrb[9].mxu0  ;;  %v460_v55 = vsel %vm361_vm4, %v456_v48, -1e+32 }
 0x221   :  { %v453_v56 = vpop.f32.mrb[10].mxu0  ;;  %v463_v57 = vsel %vm462_vm5, %v460_v55, -inf }
 0x222   :  { %464 = vmax.xlane.f32.xlu0 %v463_v57  ;;  %v1346_v58 = vpop.f32.mrb[11].mxu0  ;;  %v461_v59 = vsel %vm361_vm4, %v457_v52, -1e+32 }
 0x223   :  { %v466_v60 = vsel %vm462_vm5, %v461_v59, -inf }
 0x226   :  { %467 = vmax.xlane.f32.xlu0 %v466_v60 }
 0x23c   :  { %593 = vrot.lane.b32.xlu0 %v1269_v22, %s1645_s4 }
 0x2af   :  { %v465_v61 = vpop.xlane.xlu0 %464 }
 0x2b0   :  { %v469_v62 = vsub.f32 %v460_v55, %v465_v61 }
 0x2b2   :  { %v471_v63 = vmul.f32 1.442695, %v469_v62 }
 0x2b3   :  { %v468_v1 = vpop.xlane.xlu0 %467 }
 0x2b4   :  { %1440 = vpow2.f32 %v471_v63  ;;  %v470_v2 = vsub.f32 %v461_v59, %v468_v1 }
 0x2b6   :  { %v473_v3 = vmul.f32 1.442695, %v470_v2 }
 0x2b7   :  { %v594_v15 = vpop.permute.xlu0 %593 }
 0x2b8   :  { %1442 = vpow2.f32 %v473_v3  ;;  %v599_v20 = vsel %vm363_vm2, %v594_v15, 0  ;;  %v1432_v15 = vld [vmem:[#allocation8 + $0x8] sm:$0xff]  }
 0x2be   :  { %v1441_v4 = vpop.eup %1440 }
 0x2bf   :  { %v475_v7 = vsel %vm462_vm5, %v1441_v4, 0.0 }
 0x2c0   :  { %476 = vadd.xlane.f32.xlu1 %v475_v7 }
 0x2c2   :  { %v1443_v8 = vpop.eup %1442 }
 0x2c3   :  { %v478_v9 = vsel %vm462_vm5, %v1443_v8, 0.0 }
 0x2c4   :  { %479 = vadd.xlane.f32.xlu1 %v478_v9 }
 0x2d5   :  { %591 = vrot.lane.b32.xlu1 %v1267_v30, %s1645_s4 }
 0x2d9   :  { %641 = vrot.lane.b32.xlu1 %v1268_v32, %s1645_s4 }
 0x34d   :  { %v477_v11 = vpop.xlane.xlu1 %476 }
 0x34e   :  { %1444 = vrcp.f32 %v477_v11 }
 0x351   :  { %v480_v12 = vpop.xlane.xlu1 %479 }
 0x352   :  { %1446 = vrcp.f32 %v480_v12 }
 0x355   :  { %v592_v24 = vpop.permute.xlu1 %591 }
 0x358   :  { %v1445_v13 = vpop.eup %1444 }
 0x359   :  { %v483_v14 = vmul.f32 %v1445_v13, %v1441_v4  ;;  %v642_v25 = vpop.permute.xlu1 %641 }
 0x35b   :  { %v487_v16 = vsel %vm362_vm6, %v483_v14, 0.0  ;;  %v1431_v14 = vld [vmem:[#allocation8] sm:$0xff]  }
 0x35c   :  { %v1447_v17 = vpop.eup %1446  ;;  %489 = vst.msk [vmem:[#allocation13] sm:$0xff] %vm462_vm5, %v487_v16  ;;  %v491_v18 = vpack.c.bf16 %v487_v16, %v487_v16 }
 0x35d   :  { %v484_v19 = vmul.f32 %v1447_v17, %v1443_v8 }
 0x35e   :  { %1350 = vmatmul.mubr.msk.bf16.vlgmr.msra.gmra.mrb[8].mxu1 %vm462_vm5, %v491_v18 }
 0x35f   :  { %1360 = vmatpush3.bf16.xpose.msra.mxu1 %v599_v20  ;;  %v488_v21 = vsel %vm362_vm6, %v484_v19, 0.0  ;;  %1361 = vmatprep.mubr.msk.bf16.mxu1 %vm1644_vm0, %v1643_v0 }
 0x360   :  { %490 = vst.msk [vmem:[#allocation13 + $0x10] sm:$0xff] %vm462_vm5, %v488_v21  ;;  %v492_v22 = vpack.c.bf16 %v488_v21, %v488_v21  ;;  %1371 = vmatprep.subr.bf16.mxu1 %v1643_v0 }
 0x362   :  { %1356 = vmatmul.mubr.msk.bf16.vlgmr.msra.gmra.mrb[12].mxu0 %vm462_vm5, %v492_v22 }
 0x363   :  { %1366 = vmatpush3.bf16.xpose.msra.mxu0 %v649_v23  ;;  %1367 = vmatprep.mubr.msk.bf16.mxu0 %vm1644_vm0, %v1643_v0 }
 0x364   :  { %1377 = vmatprep.subr.bf16.mxu0 %v1643_v0 }
 0x366   :  { %1362 = vmatmul.mubr.msk.bf16.vlgmr.msra.gmra.mrb[12].mxu1 %vm363_vm2, %v592_v24 }
 0x367   :  { %1373 = vmatprep.mubr.msk.bf16.mxu1 %vm1644_vm0, %v1643_v0 }
 0x36a   :  { %1368 = vmatmul.mubr.msk.bf16.vlgmr.msra.gmra.mrb[16].mxu0 %vm363_vm2, %v642_v25 }
 0x36b   :  { %1379 = vmatprep.mubr.msk.bf16.mxu0 %vm1644_vm0, %v1643_v0 }
 0x431   :  { %v534_v26 = vpop.f32.mrb[8].mxu1 }
 0x432   :  { %v586_v27 = vpack.c.bf16 %v534_v26, %v534_v26  ;;  %v1351_v28 = vpop.f32.mrb[9].mxu1 }
 0x433   :  { %v537_v29 = vpop.f32.mrb[10].mxu1  ;;  %v1248_v28 = vld [vmem:[#allocation9] ss:$0 sm:$0xff] }
 0x434   :  { %589 = vst.msk [vmem:[#allocation2] sm:$0xf] %vm588_vm7, %v586_v27  ;;  %v1352_v30 = vpop.f32.mrb[11].mxu1 }
 0x435   :  { %v580_v31 = vpop.f32.mrb[12].mxu0 }
 0x436   :  { %v587_v32 = vpack.c.bf16 %v580_v31, %v580_v31  ;;  %v1357_v33 = vpop.f32.mrb[13].mxu0 }
 0x437   :  { %v583_v34 = vpop.f32.mrb[14].mxu0 }
 0x438   :  { %590 = vst.msk [vmem:[#allocation2 + $0x4] sm:$0xf] %vm588_vm7, %v587_v32  ;;  %v1358_v35 = vpop.f32.mrb[15].mxu0 }
 0x439   :  { %v635_v36 = vpop.f32.mrb[12].mxu1 }
 0x43a   :  { %v691_v37 = vmul.f32 0.25, %v635_v36  ;;  %v1363_v39 = vpop.f32.mrb[13].mxu1 }
 0x43b   :  { %v638_v40 = vpop.f32.mrb[14].mxu1 }
 0x43c   :  { %v1364_v41 = vpop.f32.mrb[15].mxu1  ;;  %v693_v43 = vsel %vm361_vm4, %v691_v37, -1e+32 }
 0x43d   :  { %v685_v44 = vpop.f32.mrb[16].mxu0  ;;  %v695_v47 = vsel %vm462_vm5, %v693_v43, -inf }
 0x43e   :  { %v692_v48 = vmul.f32 0.25, %v685_v44  ;;  %696 = vmax.xlane.f32.xlu0 %v695_v47  ;;  %v1369_v49 = vpop.f32.mrb[17].mxu0 }
 0x43f   :  { %v688_v50 = vpop.f32.mrb[18].mxu0 }
 0x440   :  { %v1370_v51 = vpop.f32.mrb[19].mxu0  ;;  %v694_v52 = vsel %vm361_vm4, %v692_v48, -1e+32 }
 0x441   :  { %v698_v53 = vsel %vm462_vm5, %v694_v52, -inf }
 0x442   :  { %699 = vmax.xlane.f32.xlu1 %v698_v53 }
 0x453   :  { %772 = vrot.lane.b32.xlu1 %v1897_v42, %s1645_s4 }
 0x4cb   :  { %v697_v54 = vpop.xlane.xlu0 %696 }
 0x4cc   :  { %v701_v55 = vsub.f32 %v693_v43, %v697_v54 }
 0x4ce   :  { %v703_v56 = vmul.f32 1.442695, %v701_v55 }
 0x4cf   :  { %v700_v57 = vpop.xlane.xlu1 %699 }
 0x4d0   :  { %1448 = vpow2.f32 %v703_v56  ;;  %v702_v58 = vsub.f32 %v694_v52, %v700_v57  ;;  %v1435_v52 = vld [vmem:[%s2079_s11 + $0x8] sm:$0xff]  }
 0x4d2   :  { %v705_v59 = vmul.f32 1.442695, %v702_v58 }
 0x4d3   :  { %v773_v60 = vpop.permute.xlu1 %772 }
 0x4d4   :  { %1450 = vpow2.f32 %v705_v59  ;;  %v778_v61 = vsel %vm496_vm3, %v773_v60, 0 }
 0x4d5   :  { %1378 = vmatpush3.bf16.msra.mxu0 %v778_v61  ;;  %v1253_v61 = vld [vmem:[#allocation11] ss:$0 sm:$0xff] }
 0x4d6   :  { %1391 = vmatprep.subr.bf16.mxu0 %v1643_v0 }
 0x4da   :  { %v1449_v46 = vpop.eup %1448 }
 0x4db   :  { %v707_v62 = vsel %vm462_vm5, %v1449_v46, 0.0 }
 0x4dc   :  { %708 = vadd.xlane.f32.xlu0 %v707_v62 }
 0x4de   :  { %v1451_v63 = vpop.eup %1450 }
 0x4df   :  { %v710_v42 = vsel %vm462_vm5, %v1451_v63, 0.0 }
 0x4e0   :  { %711 = vadd.xlane.f32.xlu0 %v710_v42  ;;  %v1254_v42 = vld [vmem:[%s2078_s10] ss:$0 sm:$0xff] }
 0x4f6   :  { %724 = vrot.lane.b32.xlu0 %v1893_v38, %s1645_s4 }
 0x569   :  { %v709_v1 = vpop.xlane.xlu0 %708 }
 0x56a   :  { %1452 = vrcp.f32 %v709_v1 }
 0x56d   :  { %v712_v2 = vpop.xlane.xlu0 %711 }
 0x56e   :  { %1454 = vrcp.f32 %v712_v2 }
 0x571   :  { %v725_v3 = vpop.permute.xlu0 %724 }
 0x572   :  { %v730_v4 = vsel %vm496_vm3, %v725_v3, 0 }
 0x573   :  { %1372 = vmatpush3.bf16.msra.mxu1 %v730_v4 }
 0x574   :  { %v1453_v7 = vpop.eup %1452  ;;  %1383 = vmatprep.subr.bf16.mxu1 %v1643_v0 }
 0x575   :  { %v715_v8 = vmul.f32 %v1453_v7, %v1449_v46  ;;  %v1436_v7 = vld [vmem:[%s2081_s13] sm:$0xff]  }
 0x577   :  { %v717_v9 = vsel %vm362_vm6, %v715_v8, 0.0  ;;  %v1437_v8 = vld [vmem:[%s2081_s13 + $0x8] sm:$0xff]  }
 0x578   :  { %v1455_v10 = vpop.eup %1454  ;;  %720 = vst.msk [vmem:[#allocation13 + $0x8] sm:$0xff] %vm462_vm5, %v717_v9  ;;  %v722_v11 = vpack.c.bf16 %v717_v9, %v717_v9  ;;  %v1438_v9 = vld [vmem:[%s2081_s13 + $0x10] sm:$0xff]  }
 0x579   :  { %v716_v38 = vmul.f32 %v1455_v10, %v1451_v63  ;;  %v1439_v10 = vld [vmem:[%s2081_s13 + $0x18] sm:$0xff]  }
 0x57a   :  { %1374 = vmatmul.mubr.msk.bf16.vlgmr.msra.gmra.mrb[16].mxu1 %vm462_vm5, %v722_v11  ;;  %v1255_v11 = vld [vmem:[%s2080_s12] ss:$0 sm:$0xff] }
 0x57b   :  { %v718_v12 = vsel %vm362_vm6, %v716_v38, 0.0  ;;  %1387 = vmatprep.mubr.msk.bf16.mxu1 %vm1644_vm0, %v1643_v0  ;;  %1384 = vmatpush3.bf16.msra.mxu1 %v1431_v14 }
 0x57c   :  { %721 = vst.msk [vmem:[#allocation13 + $0x18] sm:$0xff] %vm462_vm5, %v718_v12  ;;  %v723_v13 = vpack.c.bf16 %v718_v12, %v718_v12  ;;  %1385 = vmatprep.subr.bf16.mxu1 %v1643_v0 }
 0x57e   :  { %1380 = vmatmul.mubr.msk.bf16.vlgmr.msra.gmra.mrb[20].mxu0 %vm462_vm5, %v723_v13 }
 0x57f   :  { %1395 = vmatprep.mubr.msk.bf16.mxu0 %vm1644_vm0, %v1643_v0  ;;  %1386 = vmatpush3.bf16.msra.mxu1 %v1432_v15 }
 0x580   :  { %1399 = vmatprep.subr.bf16.mxu1 %v1643_v0 }
 0x64d   :  { %v766_v16 = vpop.f32.mrb[16].mxu1 }
 0x64e   :  { %v1273_v45 = vpack.c.bf16 %v766_v16, %v766_v16  ;;  %v1375_v17 = vpop.f32.mrb[17].mxu1 }
 0x64f   :  { %v769_v18 = vpop.f32.mrb[18].mxu1 }
 0x650   :  { %828 = vrot.lane.b32.xlu1 %v1273_v45, %s1646_s6  ;;  %v1376_v19 = vpop.f32.mrb[19].mxu1 }
 0x651   :  { %v814_v20 = vpop.f32.mrb[20].mxu0 }
 0x652   :  { %v1274_v21 = vpack.c.bf16 %v814_v20, %v814_v20  ;;  %v1381_v22 = vpop.f32.mrb[21].mxu0 }
 0x653   :  { %v817_v23 = vpop.f32.mrb[22].mxu0 }
 0x654   :  { %830 = vrot.lane.b32.xlu1 %v1274_v21, %s1646_s6  ;;  %v1382_v24 = vpop.f32.mrb[23].mxu0 }
 0x6c2   :  { %v829_v25 = vpop.permute.xlu1 %828 }
 0x6c3   :  { %835 = vst.msk [vmem:[#allocation2] sm:$0xf] %vm834_vm8, %v829_v25 }
 0x6c6   :  { %v831_v26 = vpop.permute.xlu1 %830 }
 0x6c7   :  { %836 = vst.msk [vmem:[#allocation2 + $0x4] sm:$0xf] %vm834_vm8, %v831_v26 }
 0x6ce   :  { %v1433_v27 = vld [vmem:[#allocation2] sm:$0xff]  }
 0x6cf   :  { %1388 = vmatmul.mubr.msk.bf16.vlgmr.msra.gmra.mrb[20].mxu1 %vm183_vm1, %v1433_v27 }
 0x6d0   :  { %1407 = vmatprep.mubr.msk.bf16.mxu1 %vm1644_vm0, %v1643_v0  ;;  %1400 = vmatpush3.bf16.msra.mxu1 %v1436_v7 }
 0x6d1   :  { %1401 = vmatprep.subr.bf16.mxu1 %v1643_v0 }
 0x6d4   :  { %1402 = vmatpush3.bf16.msra.mxu1 %v1437_v8  ;;  %v1259_v8 = vld [vmem:[%s2082_s14] ss:$0 sm:$0xff]  ;;  %s1648_s14 = smov [#allocation13]  }
 0x6d5   :  { %1403 = vmatprep.subr.bf16.mxu1 %v1643_v0  ;;  %s1205_s26 = sshll.u32 %s1648_s14, 4  ;;  %s1206_s26 = int_to_ptr.vmem [resolvable:$true] %s1205_s26 }
 0x6d6   :  { %s1582_s29 = scalar_lea.vmem %s1206_s26, 512  ;;  %p1587_p13 = scmp.lt.s32.totalorder %s1206_s26, %s1206_s26 }
 0x6d7   :  { %p1583_p12 = scmp.ne.s32.totalorder %s1206_s26, %s1582_s29  ;;  %p1588_p0 = scmp.lt.s32.totalorder %s1582_s29, %s1582_s29 }
 0x6d8   :  { %1404 = vmatpush3.bf16.msra.mxu1 %v1438_v9 }
 0x6d9   :  { %1405 = vmatprep.subr.bf16.mxu1 %v1643_v0  ;;  %p1589_p1 = por %p1588_p0, %p1587_p13 }
 0x6db   :  { %p1590_p2 = pnand %p1589_p1, %p1583_p12 }
 0x6dc   :  { %1406 = vmatpush3.bf16.msra.mxu1 %v1439_v10 }
 0x7a2   :  { %v899_v29 = vpop.f32.mrb[20].mxu1 }
 0x7a3   :  { %v900_v30 = vadd.f32 %v1248_v28, %v899_v29  ;;  %v1389_v31 = vpop.f32.mrb[21].mxu1 }
 0x7a4   :  { %v902_v32 = vpop.f32.mrb[22].mxu1 }
 0x7a5   :  { %v903_v33 = vadd.f32 %v1248_v28, %v902_v32  ;;  %v1390_v34 = vpop.f32.mrb[23].mxu1  ;;  %v906_v35 = vadd.f32 %v900_v30, %v1846_v5 }
 0x7a7   :  { %v908_v36 = vsel %vm183_vm1, %v906_v35, 0.0  ;;  %v907_v37 = vadd.f32 %v903_v33, %v1853_v6  ;;  %v1434_v6 = vld [vmem:[%s2079_s11] sm:$0xff]  }
 0x7a8   :  { %909 = vadd.xlane.f32.xlu0 %v908_v36  ;;  %1392 = vmatpush3.bf16.msra.mxu0 %v1434_v6 }
 0x7a9   :  { %v911_v39 = vsel %vm183_vm1, %v907_v37, 0.0  ;;  %1393 = vmatprep.subr.bf16.mxu0 %v1643_v0 }
 0x7aa   :  { %912 = vadd.xlane.f32.xlu1 %v911_v39 }
 0x7ac   :  { %1394 = vmatpush3.bf16.msra.mxu0 %v1435_v52 }
 0x835   :  { %v910_v40 = vpop.xlane.xlu0 %909 }
 0x836   :  { %v915_v41 = vmul.f32 0.03125, %v910_v40 }
 0x837   :  { %v913_v43 = vpop.xlane.xlu1 %912 }
 0x838   :  { %v917_v44 = vsub.f32 %v906_v35, %v915_v41  ;;  %v916_v47 = vmul.f32 0.03125, %v913_v43 }
 0x83a   :  { %v918_v48 = vsub.f32 %v907_v37, %v916_v47  ;;  %v919_v49 = vmul.f32 %v917_v44, %v917_v44 }
 0x83c   :  { %v921_v50 = vsel %vm183_vm1, %v919_v49, 0.0  ;;  %v920_v51 = vmul.f32 %v918_v48, %v918_v48 }
 0x83d   :  { %922 = vadd.xlane.f32.xlu0 %v921_v50 }
 0x83e   :  { %v924_v5 = vsel %vm183_vm1, %v920_v51, 0.0 }
 0x841   :  { %925 = vadd.xlane.f32.xlu0 %v924_v5 }
 0x8ca   :  { %v923_v53 = vpop.xlane.xlu0 %922 }
 0x8cb   :  { %v927_v54 = vmul.f32 0.03125, %v923_v53 }
 0x8cd   :  { %v929_v55 = vadd.f32 1e-05, %v927_v54 }
 0x8ce   :  { %v926_v56 = vpop.xlane.xlu0 %925 }
 0x8cf   :  { %1456 = vrsqrt.f32 %v929_v55  ;;  %v928_v57 = vmul.f32 0.03125, %v926_v56  ;;  %v1647_v55 = vmov -1.0  }
 0x8d1   :  { %v930_v58 = vadd.f32 1e-05, %v928_v57 }
 0x8d3   :  { %1458 = vrsqrt.f32 %v930_v58 }
 0x8d9   :  { %v1457_v59 = vpop.eup %1456 }
 0x8da   :  { %v933_v60 = vmul.f32 %v1457_v59, %v917_v44 }
 0x8dc   :  { %v941_v62 = vmul.f32 %v1253_v61, %v933_v60 }
 0x8dd   :  { %v1459_v46 = vpop.eup %1458 }
 0x8de   :  { %v934_v63 = vmul.f32 %v1459_v46, %v918_v48  ;;  %v1996_v2 = vadd.f32 %v1254_v42, %v941_v62 }
 0x8e0   :  { %v942_v1 = vmul.f32 %v1253_v61, %v934_v63 }
 0x8e2   :  { %v1998_v3 = vadd.f32 %v1254_v42, %v942_v1 }
 0x8e4   :  { %v951_v4 = vpack.c.bf16 %v1998_v3, %v1996_v2 }
 0x8e6   :  { %1396 = vmatmul.mubr.msk.bf16.vlgmr.msra.gmra.mrb[24].mxu0 %vm183_vm1, %v951_v4 }
 0x9b9   :  { %v1007_v38 = vpop.f32.mrb[24].mxu0 }
 0x9ba   :  { %v1008_v12 = vadd.f32 %v1255_v11, %v1007_v38  ;;  %v1397_v13 = vpop.f32.mrb[25].mxu0 }
 0x9bb   :  { %v1010_v14 = vpop.f32.mrb[26].mxu0 }
 0x9bc   :  { %v1014_v15 = vmul.f32 0.70710677, %v1008_v12  ;;  %v1011_v16 = vadd.f32 %v1255_v11, %v1010_v14  ;;  %v1398_v45 = vpop.f32.mrb[27].mxu0  ;;  %v1060_v62 = vmul.f32 0.5, %v1008_v12 }
 0x9be   :  { %v1020_v17 = vand.u32 2147483647, %v1014_v15  ;;  %v1015_v18 = vmul.f32 0.70710677, %v1011_v16  ;;  %vm1016_vm9 = vcmp.ge.f32.partialorder %v1014_v15, 0.0  ;;  %v1061_v63 = vmul.f32 0.5, %v1011_v16 }
 0x9bf   :  { %v1018_v56 = vsel %vm1016_vm9, 1.0, %v1647_v55 }
 0x9c0   :  { %v1022_v19 = vmul.f32 0.3275911, %v1020_v17  ;;  %v1021_v0 = vand.u32 2147483647, %v1015_v18  ;;  %v1046_v23 = vsub.f32 0.0, %v1020_v17  ;;  %vm1017_vm10 = vcmp.ge.f32.partialorder %v1015_v18, 0.0 }
 0x9c1   :  { %v1019_v60 = vsel %vm1017_vm10, 1.0, %v1647_v55 }
 0x9c2   :  { %v1024_v20 = vadd.f32 1.0, %v1022_v19  ;;  %v1023_v21 = vmul.f32 0.3275911, %v1021_v0  ;;  %v1047_v24 = vsub.f32 0.0, %v1021_v0  ;;  %v1048_v26 = vmul.f32 %v1046_v23, %v1020_v17 }
 0x9c4   :  { %1460 = vrcp.f32 %v1024_v20  ;;  %v1025_v22 = vadd.f32 1.0, %v1023_v21  ;;  %v1049_v30 = vmul.f32 %v1047_v24, %v1021_v0  ;;  %v1050_v31 = vmul.f32 1.442695, %v1048_v26 }
 0x9c6   :  { %1462 = vrcp.f32 %v1025_v22  ;;  %v1052_v36 = vmul.f32 1.442695, %v1049_v30 }
 0x9c7   :  { %1464 = vpow2.f32 %v1050_v31 }
 0x9c8   :  { %1466 = vpow2.f32 %v1052_v36 }
 0x9ce   :  { %v1461_v25 = vpop.eup %1460 }
 0x9cf   :  { %v1028_v27 = vmul.f32 1.0614054, %v1461_v25 }
 0x9d0   :  { %v1463_v28 = vpop.eup %1462 }
 0x9d1   :  { %v1030_v29 = vadd.f32 -1.4531521, %v1028_v27  ;;  %v1029_v32 = vmul.f32 1.0614054, %v1463_v28  ;;  %v1465_v51 = vpop.eup %1464 }
 0x9d2   :  { %v1467_v53 = vpop.eup %1466 }
 0x9d3   :  { %v1032_v33 = vmul.f32 %v1461_v25, %v1030_v29  ;;  %v1031_v34 = vadd.f32 -1.4531521, %v1029_v32 }
 0x9d5   :  { %v1034_v35 = vadd.f32 1.4214138, %v1032_v33  ;;  %v1033_v37 = vmul.f32 %v1463_v28, %v1031_v34 }
 0x9d7   :  { %v1036_v39 = vmul.f32 %v1461_v25, %v1034_v35  ;;  %v1035_v40 = vadd.f32 1.4214138, %v1033_v37 }
 0x9d9   :  { %v1038_v41 = vadd.f32 -0.28449672, %v1036_v39  ;;  %v1037_v43 = vmul.f32 %v1463_v28, %v1035_v40 }
 0x9db   :  { %v1040_v44 = vmul.f32 %v1461_v25, %v1038_v41  ;;  %v1039_v47 = vadd.f32 -0.28449672, %v1037_v43 }
 0x9dd   :  { %v1042_v48 = vadd.f32 0.2548296, %v1040_v44  ;;  %v1041_v49 = vmul.f32 %v1463_v28, %v1039_v47 }
 0x9df   :  { %v1044_v50 = vmul.f32 %v1461_v25, %v1042_v48  ;;  %v1043_v5 = vadd.f32 0.2548296, %v1041_v49 }
 0x9e1   :  { %v1054_v6 = vmul.f32 %v1465_v51, %v1044_v50  ;;  %v1045_v52 = vmul.f32 %v1463_v28, %v1043_v5 }
 0x9e3   :  { %v1056_v54 = vsub.f32 1.0, %v1054_v6  ;;  %v1055_v57 = vmul.f32 %v1467_v53, %v1045_v52 }
 0x9e5   :  { %v1058_v58 = vmul.f32 %v1056_v54, %v1018_v56  ;;  %v1057_v59 = vsub.f32 1.0, %v1055_v57 }
 0x9e7   :  { %v1062_v61 = vadd.f32 1.0, %v1058_v58  ;;  %v1059_v46 = vmul.f32 %v1057_v59, %v1019_v60 }
 0x9e9   :  { %v1063_v42 = vadd.f32 1.0, %v1059_v46  ;;  %v1064_v1 = vmul.f32 %v1062_v61, %v1060_v62 }
 0x9eb   :  { %v1065_v4 = vmul.f32 %v1063_v42, %v1061_v63 }
 0x9ed   :  { %v1066_v7 = vpack.c.bf16 %v1065_v4, %v1064_v1 }
 0x9ef   :  { %1408 = vmatmul.mubr.msk.bf16.vlgmr.msra.gmra.mrb[24].mxu1 %vm1097_vm11, %v1066_v7 }
 0xac2   :  { %v1135_v9 = vpop.f32.mrb[24].mxu1 }
 0xac3   :  { %v1136_v10 = vadd.f32 %v1259_v8, %v1135_v9  ;;  %v1409_v11 = vpop.f32.mrb[25].mxu1 }
 0xac4   :  { %v1138_v38 = vpop.f32.mrb[26].mxu1 }
 0xac5   :  { %v1139_v13 = vadd.f32 %v1259_v8, %v1138_v38  ;;  %v1410_v14 = vpop.f32.mrb[27].mxu1  ;;  %v1142_v15 = vadd.f32 %v1136_v10, %v1996_v2 }
 0xac7   :  { %v1144_v12 = vsel %vm183_vm1, %v1142_v15, 0.0  ;;  %v1143_v16 = vadd.f32 %v1139_v13, %v1998_v3 }
 0xac8   :  { %1145 = vadd.xlane.f32.xlu0 %v1144_v12 }
 0xac9   :  { %v1147_v45 = vsel %vm183_vm1, %v1143_v16, 0.0 }
 0xaca   :  { %1148 = vadd.xlane.f32.xlu1 %v1147_v45 }
 0xb55   :  { %v1146_v17 = vpop.xlane.xlu0 %1145 }
 0xb56   :  { %v1150_v18 = vmul.f32 0.03125, %v1146_v17 }
 0xb57   :  { %v1149_v19 = vpop.xlane.xlu1 %1148 }
 0xb58   :  { %v1152_v0 = vsub.f32 %v1142_v15, %v1150_v18  ;;  %v1151_v20 = vmul.f32 0.03125, %v1149_v19 }
 0xb5a   :  { %v1153_v21 = vsub.f32 %v1143_v16, %v1151_v20  ;;  %v1154_v22 = vmul.f32 %v1152_v0, %v1152_v0 }
 0xb5c   :  { %v1156_v23 = vsel %vm183_vm1, %v1154_v22, 0.0  ;;  %v1155_v24 = vmul.f32 %v1153_v21, %v1153_v21 }
 0xb5d   :  { %1157 = vadd.xlane.f32.xlu0 %v1156_v23 }
 0xb5e   :  { %v1159_v2 = vsel %vm183_vm1, %v1155_v24, 0.0 }
 0xb5f   :  { %1160 = vadd.xlane.f32.xlu1 %v1159_v2 }
 0xb60   :  { %1593 = shalt.err (!%p1590_p2)
}
 0xb61   :  { %s1594_s4 = scalar_lea.hbm %s2086_s18, 512 }
 0xb62   :  { %p1595_p3 = scmp.ne.s32.totalorder %s2086_s18, %s1594_s4  ;;  %p1598_p4 = scmp.lt.u32.totalorder %s1594_s4, %s2086_s18 }
 0xb64   :  { %p1600_p5 = pnand %p1598_p4, %p1595_p3 }
 0xb66   :  { %1603 = shalt.err (!%p1600_p5)
}
 0xb67   :  { %s1649_s9 = smov 128   ;;  %s1650_s0 = smov 8   ;;  %v1265_v31 = vld [vmem:[%s2083_s15] ss:$0 sm:$0xff] }
 0xb68   :  { %1211 = dma.vmem_to_hbm [thread:$0]  %s1206_s26, 512, %s2086_s18, [#allocation14], %s1649_s9, %s1649_s9, %s1650_s0  }
 0xb69   :  { %v1266_v34 = vld [vmem:[%s2084_s16] ss:$0 sm:$0xff]  ;;  %s1651_s18 = smov [#allocation12]  }
 0xb6a   :  { %s1193_s2 = sshll.u32 %s1651_s18, 4  ;;  %s1194_s2 = int_to_ptr.vmem [resolvable:$true] %s1193_s2 }
 0xb6b   :  { %s1604_s10 = scalar_lea.vmem %s1194_s2, 256  ;;  %p1609_p7 = scmp.lt.s32.totalorder %s1194_s2, %s1194_s2 }
 0xb6c   :  { %p1605_p6 = scmp.ne.s32.totalorder %s1194_s2, %s1604_s10  ;;  %p1610_p8 = scmp.lt.s32.totalorder %s1604_s10, %s1604_s10 }
 0xb6e   :  { %p1611_p9 = por %p1610_p8, %p1609_p7 }
 0xb70   :  { %p1612_p10 = pnand %p1611_p9, %p1605_p6 }
 0xbea   :  { %v1158_v3 = vpop.xlane.xlu0 %1157 }
 0xbeb   :  { %v1162_v25 = vmul.f32 0.03125, %v1158_v3 }
 0xbec   :  { %v1161_v26 = vpop.xlane.xlu1 %1160 }
 0xbed   :  { %v1164_v27 = vadd.f32 1e-05, %v1162_v25  ;;  %v1163_v28 = vmul.f32 0.03125, %v1161_v26 }
 0xbef   :  { %1468 = vrsqrt.f32 %v1164_v27  ;;  %v1165_v29 = vadd.f32 1e-05, %v1163_v28 }
 0xbf1   :  { %1470 = vrsqrt.f32 %v1165_v29 }
 0xbf9   :  { %v1469_v30 = vpop.eup %1468 }
 0xbfa   :  { %v1168_v32 = vmul.f32 %v1469_v30, %v1152_v0 }
 0xbfb   :  { %v1471_v33 = vpop.eup %1470 }
 0xbfc   :  { %v1176_v35 = vmul.f32 %v1265_v31, %v1168_v32  ;;  %v1169_v36 = vmul.f32 %v1471_v33, %v1153_v21 }
 0xbfe   :  { %v1177_v37 = vmul.f32 %v1265_v31, %v1169_v36  ;;  %v1184_v39 = vadd.f32 %v1266_v34, %v1176_v35 }
 0xc00   :  { %v1185_v40 = vadd.f32 %v1266_v34, %v1177_v37  ;;  %1186 = vst.msk [vmem:[#allocation12] sm:$0xff] %vm183_vm1, %v1184_v39 }
 0xc02   :  { %1187 = vst.msk [vmem:[#allocation12 + $0x8] sm:$0xff] %vm183_vm1, %v1185_v40 }
 0xc03   :  { %1615 = shalt.err (!%p1612_p10)
}
 0xc04   :  { %s1616_s5 = scalar_lea.hbm %s2085_s17, 256 }
 0xc05   :  { %p1617_p11 = scmp.ne.s32.totalorder %s2085_s17, %s1616_s5  ;;  %p1620_p12 = scmp.lt.u32.totalorder %s1616_s5, %s2085_s17 }
 0xc07   :  { %p1622_p13 = pnand %p1620_p12, %p1617_p11 }
 0xc09   :  { %1625 = shalt.err (!%p1622_p13)
}
 0xc0a   :  { %1199 = dma.vmem_to_hbm [thread:$0]  %s1194_s2, 256, %s2085_s17, [#allocation5], %s1649_s9, %s1649_s9, %s1650_s0  }
 0xc0b   :  { %1632 = dma.done.wait [#allocation5], 256  }
 0xc0c   :  { %1633 = vsyncadd [#allocation5], 4294967040 }
 0xc0d   :  { %1634 = dma.done.wait [#allocation14], 512  }
 0xc0e   :  { %1635 = vsyncadd [#allocation14], 4294966784 }
 0xc0f   :  { %1218 = vsyncpa [#allocation4], 1 }
 0xc10   :  { %1219 = vsyncpa [#allocation7], 1 }
 0xc11   :  { %1220 = vsyncpa [#allocation10], 1 }
 0xc12   :  { %1221 = vsyncpa [#allocation5], 1 }
 0xc13   :  { %1222 = vsyncpa [#allocation14], 1 }

</bundles_post_ra>
